<compile_context>
chip_gen: v7x
topology: tpu7x:2x2x1
jax: 0.10.0
libtpu: 0.0.40
codegen_flags: <defaults>
</compile_context>

<pallas_src>
import jax
import jax.numpy as jnp
from jax.experimental import pallas as pl
from jax.experimental.pallas import tpu as pltpu

F_IN = 300            # input feature count (kept un-padded)
H1, H2, H3 = 256, 128, 64
NT = 8                # padded rows of W4^T (row 0 is the real output)
MAX_B_TILE = 1024     # upper bound on batch tile (rows per grid step)


def mlp_kernel(x_ref, s0_ref, t0_ref, w1_ref, b1_ref, w2_ref, b2_ref,
               w3_ref, b3_ref, w4t_ref, b4_ref, o_ref):
    # BN0 in fp32 before the bf16 cast; BN1..BN3 pre-folded into W/b;
    # dropout is identity in eval mode.  MXU matmuls with fp32 accumulation.
    h = (x_ref[...] * s0_ref[...] + t0_ref[...]).astype(jnp.bfloat16)    # (Bt, 300)
    z = jnp.dot(h, w1_ref[...], preferred_element_type=jnp.float32) + b1_ref[...]
    h = jnp.maximum(z, 0.0).astype(jnp.bfloat16)                         # (Bt, 256)
    z = jnp.dot(h, w2_ref[...], preferred_element_type=jnp.float32) + b2_ref[...]
    h = jnp.maximum(z, 0.0).astype(jnp.bfloat16)                         # (Bt, 128)
    z = jnp.dot(h, w3_ref[...], preferred_element_type=jnp.float32) + b3_ref[...]
    h = jnp.maximum(z, 0.0).astype(jnp.bfloat16)                         # (Bt, 64)
    # Final layer computed transposed so the store is lane-dense along batch:
    # o[n, b] = sum_k W4^T[n, k] * h[b, k]   (row 0 is the real output).
    zt = jnp.einsum("nk,bk->nb", w4t_ref[...], h,
                    preferred_element_type=jnp.float32)                  # (8, Bt)
    o_ref[...] = zt + b4_ref[...]


def _fold_bn(gamma, beta, mean, var, eps=1e-5):
    scale = gamma / jnp.sqrt(var + eps)
    shift = beta - mean * scale
    return scale.astype(jnp.float32), shift.astype(jnp.float32)


def fold_params(params):
    """Fold BN1..BN3 into the Linear weights/biases; keep BN0 as fp32 scale/shift.

    Call ONCE (outside the per-step forward) and reuse the result.
    """
    s0, t0 = _fold_bn(*params["bn0"])
    s1, t1 = _fold_bn(*params["bn1"])
    s2, t2 = _fold_bn(*params["bn2"])
    s3, t3 = _fold_bn(*params["bn3"])

    w1f = params["w1"] * s1[None, :]
    b1f = params["b1"] * s1 + t1
    w2f = params["w2"] * s2[None, :]
    b2f = params["b2"] * s2 + t2
    w3f = params["w3"] * s3[None, :]
    b3f = params["b3"] * s3 + t3

    # W4^T padded to (8, 64): row 0 valid, rows 1..7 zero.
    w4t = jnp.zeros((NT, H3), jnp.float32).at[0, :].set(params["w4"][:, 0])

    return dict(
        s0=s0.reshape(1, F_IN), t0=t0.reshape(1, F_IN),
        w1=w1f.astype(jnp.bfloat16), b1=b1f.reshape(1, H1),
        w2=w2f.astype(jnp.bfloat16), b2=b2f.reshape(1, H2),
        w3=w3f.astype(jnp.bfloat16), b3=b3f.reshape(1, H3),
        w4t=w4t.astype(jnp.bfloat16), b4=params["b4"].reshape(1, 1),
    )


def _round_up(v, m):
    return ((v + m - 1) // m) * m


def _pick_b_tile(batch):
    # Multiple of 128 (lane-dense stores) and at least 2 grid steps when the
    # batch allows it, so both v7x TensorCores get work; capped at MAX_B_TILE.
    half = _round_up((batch + 1) // 2, 128)
    return max(128, min(MAX_B_TILE, half))


@jax.jit
def mlp_forward(x, fp):
    """x: (B, 300) float32; fp: output of fold_params. Returns (B,) float32."""
    B = x.shape[0]
    b_tile = _pick_b_tile(B)
    n_tiles = pl.cdiv(B, b_tile)
    b_pad = n_tiles * b_tile

    flops = 2 * b_pad * (F_IN * H1 + H1 * H2 + H2 * H3 + NT * H3)
    bytes_accessed = (
        B * F_IN * 4                                               # x (fp32)
        + (fp["w1"].size + fp["w2"].size + fp["w3"].size + fp["w4t"].size) * 2
        + (fp["s0"].size + fp["t0"].size + fp["b1"].size + fp["b2"].size
           + fp["b3"].size + fp["b4"].size) * 4
        + NT * B * 4)                                              # out (fp32)

    out = pl.pallas_call(
        mlp_kernel,
        out_shape=jax.ShapeDtypeStruct((NT, B), jnp.float32),
        grid=(n_tiles,),
        in_specs=[
            pl.BlockSpec((b_tile, F_IN), lambda i: (i, 0)),   # x: batch-tiled
            pl.BlockSpec((1, F_IN), lambda i: (0, 0)),        # BN0 scale
            pl.BlockSpec((1, F_IN), lambda i: (0, 0)),        # BN0 shift
            pl.BlockSpec((F_IN, H1), lambda i: (0, 0)),       # weights stay resident
            pl.BlockSpec((1, H1), lambda i: (0, 0)),
            pl.BlockSpec((H1, H2), lambda i: (0, 0)),
            pl.BlockSpec((1, H2), lambda i: (0, 0)),
            pl.BlockSpec((H2, H3), lambda i: (0, 0)),
            pl.BlockSpec((1, H3), lambda i: (0, 0)),
            pl.BlockSpec((NT, H3), lambda i: (0, 0)),         # W4^T (8, 64)
            pl.BlockSpec((1, 1), lambda i: (0, 0)),           # b4
        ],
        out_specs=pl.BlockSpec((NT, b_tile), lambda i: (0, i)),   # lane-dense store
        compiler_params=pltpu.CompilerParams(
            dimension_semantics=("parallel",),   # shards batch tiles across TCs
        ),
        cost_estimate=pl.CostEstimate(
            flops=flops, transcendentals=0, bytes_accessed=bytes_accessed),
    )(x, fp["s0"], fp["t0"], fp["w1"], fp["b1"], fp["w2"], fp["b2"],
      fp["w3"], fp["b3"], fp["w4t"], fp["b4"])

    # Row 0 holds the real output; matches the PyTorch .squeeze(-1).
    return out[0, :]


def init_params(key):
    dims = [F_IN, H1, H2, H3, 1]
    keys = jax.random.split(key, 16)
    params = {}
    ki = 0
    for li, (din, dout) in enumerate(zip(dims[:-1], dims[1:]), start=1):
        bound = 1.0 / float(din) ** 0.5
        params[f"w{li}"] = jax.random.uniform(
            keys[ki], (din, dout), jnp.float32, -bound, bound); ki += 1
        params[f"b{li}"] = jax.random.uniform(
            keys[ki], (dout,), jnp.float32, -bound, bound); ki += 1
    # BatchNorm params (non-trivial so the folding is actually exercised).
    for bi, f in enumerate([F_IN, H1, H2, H3]):
        g = 1.0 + 0.1 * jax.random.normal(keys[ki], (f,), jnp.float32); ki += 1
        b = 0.1 * jax.random.normal(keys[ki], (f,), jnp.float32); ki += 1
        m = 0.05 * jnp.arange(f, dtype=jnp.float32) / f
        v = jnp.ones((f,), jnp.float32) * (1.0 + 0.01 * bi)
        params[f"bn{bi}"] = (g, b, m, v)
    return params


def mlp_reference(x, params):
    """Plain-JAX fp32 reference of the eval-mode PyTorch module (un-folded BN)."""
    def bn(h, p, eps=1e-5):
        g, b, m, v = p
        return (h - m) / jnp.sqrt(v + eps) * g + b
    h = bn(x, params["bn0"])
    h = h @ params["w1"] + params["b1"]
    h = jnp.maximum(bn(h, params["bn1"]), 0.0)
    h = h @ params["w2"] + params["b2"]
    h = jnp.maximum(bn(h, params["bn2"]), 0.0)
    h = h @ params["w3"] + params["b3"]
    h = jnp.maximum(bn(h, params["bn3"]), 0.0)
    return (h @ params["w4"] + params["b4"]).squeeze(-1)


if __name__ == "__main__":
    key = jax.random.PRNGKey(0)
    pkey, xkey = jax.random.split(key)
    params = init_params(pkey)

    # Fold/pad params ONCE (hoisted off the per-call dispatch path).
    folded = jax.block_until_ready(fold_params(params))

    B = 200  # -> b_tile=128, 2 grid tiles (exercises grid + partial last tile)
    x = jax.random.normal(xkey, (B, F_IN), jnp.float32) * 1.5

    out = jax.block_until_ready(mlp_forward(x, folded))
    ref = mlp_reference(x, params)

    assert out.shape == (B,), out.shape
    max_err = float(jnp.max(jnp.abs(out - ref)))
    # bf16 weights/activations (fp32 accumulation, fp32 BN0): loosened tolerance.
    assert jnp.allclose(out, ref, atol=2e-2, rtol=2e-2), (max_err, out[:4], ref[:4])

    print("KERNEL_OK")
</pallas_src>

<mosaic_0001>
module attributes {stable_mosaic.version = 11 : i64} {
  func.func @mlp_kernel(%arg0: i32, %arg1: memref<128x300xf32, #tpu.memory_space<vmem>>, %arg2: memref<1x300xf32, #tpu.memory_space<vmem>>, %arg3: memref<1x300xf32, #tpu.memory_space<vmem>>, %arg4: memref<300x256xbf16, #tpu.memory_space<vmem>>, %arg5: memref<1x256xf32, #tpu.memory_space<vmem>>, %arg6: memref<256x128xbf16, #tpu.memory_space<vmem>>, %arg7: memref<1x128xf32, #tpu.memory_space<vmem>>, %arg8: memref<128x64xbf16, #tpu.memory_space<vmem>>, %arg9: memref<1x64xf32, #tpu.memory_space<vmem>>, %arg10: memref<8x64xbf16, #tpu.memory_space<vmem>>, %arg11: memref<1x1xf32, #tpu.memory_space<vmem>>, %arg12: memref<8x128xf32, #tpu.memory_space<vmem>>) attributes {dimension_semantics = [#tpu.dimension_semantics<parallel>], iteration_bounds = array<i64: 2>, scalar_prefetch = 0 : i64, scratch_operands = 0 : i64, tpu.core_type = #tpu.core_type<tc>, window_params = [{transform_indices = @transform_0, window_bounds = array<i64: 128, 300>}, {pipeline_mode = #tpu.pipeline_mode<synchronous>, transform_indices = @transform_1, window_bounds = array<i64: 1, 300>}, {pipeline_mode = #tpu.pipeline_mode<synchronous>, transform_indices = @transform_2, window_bounds = array<i64: 1, 300>}, {pipeline_mode = #tpu.pipeline_mode<synchronous>, transform_indices = @transform_3, window_bounds = array<i64: 300, 256>}, {pipeline_mode = #tpu.pipeline_mode<synchronous>, transform_indices = @transform_4, window_bounds = array<i64: 1, 256>}, {pipeline_mode = #tpu.pipeline_mode<synchronous>, transform_indices = @transform_5, window_bounds = array<i64: 256, 128>}, {pipeline_mode = #tpu.pipeline_mode<synchronous>, transform_indices = @transform_6, window_bounds = array<i64: 1, 128>}, {pipeline_mode = #tpu.pipeline_mode<synchronous>, transform_indices = @transform_7, window_bounds = array<i64: 128, 64>}, {pipeline_mode = #tpu.pipeline_mode<synchronous>, transform_indices = @transform_8, window_bounds = array<i64: 1, 64>}, {pipeline_mode = #tpu.pipeline_mode<synchronous>, transform_indices = @transform_9, window_bounds = array<i64: 8, 64>}, {pipeline_mode = #tpu.pipeline_mode<synchronous>, transform_indices = @transform_10, window_bounds = array<i64: 1, 1>}, {transform_indices = @transform_11, window_bounds = array<i64: 8, 128>}]} {
    %c0 = arith.constant 0 : index
    %c0_0 = arith.constant 0 : index
    %0 = vector.load %arg1[%c0, %c0_0] : memref<128x300xf32, #tpu.memory_space<vmem>>, vector<128x300xf32>
    %c0_1 = arith.constant 0 : index
    %c0_2 = arith.constant 0 : index
    %1 = vector.load %arg2[%c0_1, %c0_2] : memref<1x300xf32, #tpu.memory_space<vmem>>, vector<1x300xf32>
    %2 = vector.broadcast %1 : vector<1x300xf32> to vector<128x300xf32>
    %3 = arith.mulf %0, %2 : vector<128x300xf32>
    %c0_3 = arith.constant 0 : index
    %c0_4 = arith.constant 0 : index
    %4 = vector.load %arg3[%c0_3, %c0_4] : memref<1x300xf32, #tpu.memory_space<vmem>>, vector<1x300xf32>
    %5 = vector.broadcast %4 : vector<1x300xf32> to vector<128x300xf32>
    %6 = arith.addf %3, %5 : vector<128x300xf32>
    %7 = arith.truncf %6 : vector<128x300xf32> to vector<128x300xbf16>
    %c0_5 = arith.constant 0 : index
    %c0_6 = arith.constant 0 : index
    %8 = vector.load %arg4[%c0_5, %c0_6] : memref<300x256xbf16, #tpu.memory_space<vmem>>, vector<300x256xbf16>
    %cst = arith.constant dense<0.000000e+00> : vector<128x256xf32>
    %9 = tpu.matmul %7, %8, %cst {dimension_numbers = #tpu.dot_dimension_numbers<[1], [0], [0], [1], [0, 0, 1, 1], [], []>} : vector<128x300xbf16>, vector<300x256xbf16>, vector<128x256xf32> -> vector<128x256xf32>
    %c0_7 = arith.constant 0 : index
    %c0_8 = arith.constant 0 : index
    %10 = vector.load %arg5[%c0_7, %c0_8] : memref<1x256xf32, #tpu.memory_space<vmem>>, vector<1x256xf32>
    %11 = vector.broadcast %10 : vector<1x256xf32> to vector<128x256xf32>
    %12 = arith.addf %9, %11 : vector<128x256xf32>
    %cst_9 = arith.constant 0.000000e+00 : f32
    %13 = vector.broadcast %cst_9 : f32 to vector<128x256xf32>
    %14 = arith.maximumf %12, %13 : vector<128x256xf32>
    %15 = arith.truncf %14 : vector<128x256xf32> to vector<128x256xbf16>
    %c0_10 = arith.constant 0 : index
    %c0_11 = arith.constant 0 : index
    %16 = vector.load %arg6[%c0_10, %c0_11] : memref<256x128xbf16, #tpu.memory_space<vmem>>, vector<256x128xbf16>
    %cst_12 = arith.constant dense<0.000000e+00> : vector<128x128xf32>
    %17 = tpu.matmul %15, %16, %cst_12 {dimension_numbers = #tpu.dot_dimension_numbers<[1], [0], [0], [1], [0, 0, 1, 1], [], []>} : vector<128x256xbf16>, vector<256x128xbf16>, vector<128x128xf32> -> vector<128x128xf32>
    %c0_13 = arith.constant 0 : index
    %c0_14 = arith.constant 0 : index
    %18 = vector.load %arg7[%c0_13, %c0_14] : memref<1x128xf32, #tpu.memory_space<vmem>>, vector<1x128xf32>
    %19 = vector.broadcast %18 : vector<1x128xf32> to vector<128x128xf32>
    %20 = arith.addf %17, %19 : vector<128x128xf32>
    %cst_15 = arith.constant 0.000000e+00 : f32
    %21 = vector.broadcast %cst_15 : f32 to vector<128x128xf32>
    %22 = arith.maximumf %20, %21 : vector<128x128xf32>
    %23 = arith.truncf %22 : vector<128x128xf32> to vector<128x128xbf16>
    %c0_16 = arith.constant 0 : index
    %c0_17 = arith.constant 0 : index
    %24 = vector.load %arg8[%c0_16, %c0_17] : memref<128x64xbf16, #tpu.memory_space<vmem>>, vector<128x64xbf16>
    %cst_18 = arith.constant dense<0.000000e+00> : vector<128x64xf32>
    %25 = tpu.matmul %23, %24, %cst_18 {dimension_numbers = #tpu.dot_dimension_numbers<[1], [0], [0], [1], [0, 0, 1, 1], [], []>} : vector<128x128xbf16>, vector<128x64xbf16>, vector<128x64xf32> -> vector<128x64xf32>
    %c0_19 = arith.constant 0 : index
    %c0_20 = arith.constant 0 : index
    %26 = vector.load %arg9[%c0_19, %c0_20] : memref<1x64xf32, #tpu.memory_space<vmem>>, vector<1x64xf32>
    %27 = vector.broadcast %26 : vector<1x64xf32> to vector<128x64xf32>
    %28 = arith.addf %25, %27 : vector<128x64xf32>
    %cst_21 = arith.constant 0.000000e+00 : f32
    %29 = vector.broadcast %cst_21 : f32 to vector<128x64xf32>
    %30 = arith.maximumf %28, %29 : vector<128x64xf32>
    %31 = arith.truncf %30 : vector<128x64xf32> to vector<128x64xbf16>
    %c0_22 = arith.constant 0 : index
    %c0_23 = arith.constant 0 : index
    %32 = vector.load %arg10[%c0_22, %c0_23] : memref<8x64xbf16, #tpu.memory_space<vmem>>, vector<8x64xbf16>
    "tpu.trace_start"() <{level = 10 : i32, message = "nk,bk->nb"}> : () -> ()
    %cst_24 = arith.constant dense<0.000000e+00> : vector<8x128xf32>
    %33 = tpu.matmul %32, %31, %cst_24 {dimension_numbers = #tpu.dot_dimension_numbers<[1], [1], [0], [0], [0, 0, 1, 0], [], []>} : vector<8x64xbf16>, vector<128x64xbf16>, vector<8x128xf32> -> vector<8x128xf32>
    "tpu.trace_stop"() : () -> ()
    %c0_25 = arith.constant 0 : index
    %c0_26 = arith.constant 0 : index
    %34 = vector.load %arg11[%c0_25, %c0_26] : memref<1x1xf32, #tpu.memory_space<vmem>>, vector<1x1xf32>
    %35 = vector.broadcast %34 : vector<1x1xf32> to vector<8x128xf32>
    %36 = arith.addf %33, %35 : vector<8x128xf32>
    %c0_27 = arith.constant 0 : index
    %c0_28 = arith.constant 0 : index
    %37 = vector.load %arg12[%c0_27, %c0_28] : memref<8x128xf32, #tpu.memory_space<vmem>>, vector<8x128xf32>
    tpu.vector_store %arg12[%c0_27, %c0_28], %36 {strides = array<i32>} : memref<8x128xf32, #tpu.memory_space<vmem>>, vector<8x128xf32>,
    return
  }
  func.func @transform_0(%arg0: i32) -> (i32, i32) {
    %c0_i32 = arith.constant 0 : i32
    %c0_i32_0 = arith.constant 0 : i32
    return %arg0, %c0_i32 : i32, i32
  }
  func.func @transform_1(%arg0: i32) -> (i32, i32) {
    %c0_i32 = arith.constant 0 : i32
    %c0_i32_0 = arith.constant 0 : i32
    %c0_i32_1 = arith.constant 0 : i32
    return %c0_i32, %c0_i32_0 : i32, i32
  }
  func.func @transform_2(%arg0: i32) -> (i32, i32) {
    %c0_i32 = arith.constant 0 : i32
    %c0_i32_0 = arith.constant 0 : i32
    %c0_i32_1 = arith.constant 0 : i32
    return %c0_i32, %c0_i32_0 : i32, i32
  }
  func.func @transform_3(%arg0: i32) -> (i32, i32) {
    %c0_i32 = arith.constant 0 : i32
    %c0_i32_0 = arith.constant 0 : i32
    %c0_i32_1 = arith.constant 0 : i32
    return %c0_i32, %c0_i32_0 : i32, i32
  }
  func.func @transform_4(%arg0: i32) -> (i32, i32) {
    %c0_i32 = arith.constant 0 : i32
    %c0_i32_0 = arith.constant 0 : i32
    %c0_i32_1 = arith.constant 0 : i32
    return %c0_i32, %c0_i32_0 : i32, i32
  }
  func.func @transform_5(%arg0: i32) -> (i32, i32) {
    %c0_i32 = arith.constant 0 : i32
    %c0_i32_0 = arith.constant 0 : i32
    %c0_i32_1 = arith.constant 0 : i32
    return %c0_i32, %c0_i32_0 : i32, i32
  }
  func.func @transform_6(%arg0: i32) -> (i32, i32) {
    %c0_i32 = arith.constant 0 : i32
    %c0_i32_0 = arith.constant 0 : i32
    %c0_i32_1 = arith.constant 0 : i32
    return %c0_i32, %c0_i32_0 : i32, i32
  }
  func.func @transform_7(%arg0: i32) -> (i32, i32) {
    %c0_i32 = arith.constant 0 : i32
    %c0_i32_0 = arith.constant 0 : i32
    %c0_i32_1 = arith.constant 0 : i32
    return %c0_i32, %c0_i32_0 : i32, i32
  }
  func.func @transform_8(%arg0: i32) -> (i32, i32) {
    %c0_i32 = arith.constant 0 : i32
    %c0_i32_0 = arith.constant 0 : i32
    %c0_i32_1 = arith.constant 0 : i32
    return %c0_i32, %c0_i32_0 : i32, i32
  }
  func.func @transform_9(%arg0: i32) -> (i32, i32) {
    %c0_i32 = arith.constant 0 : i32
    %c0_i32_0 = arith.constant 0 : i32
    %c0_i32_1 = arith.constant 0 : i32
    return %c0_i32, %c0_i32_0 : i32, i32
  }
  func.func @transform_10(%arg0: i32) -> (i32, i32) {
    %c0_i32 = arith.constant 0 : i32
    %c0_i32_0 = arith.constant 0 : i32
    %c0_i32_1 = arith.constant 0 : i32
    return %c0_i32, %c0_i32_0 : i32, i32
  }
  func.func @transform_11(%arg0: i32) -> (i32, i32) {
    %c0_i32 = arith.constant 0 : i32
    %c0_i32_0 = arith.constant 0 : i32
    return %c0_i32, %arg0 : i32, i32
  }
}

</mosaic_0001>

<bundles_post_ra>
// kernel: mlp_forward.1
= control target key start
LH: loop header
LB: loop body
LE: loop exit
PB: predicated region body
PF: predicated region fallthrough
CT: control target
= control target key end

     0   :  { %s3054_s0 = inlined_call_operand.hbm [shape: f32[200,300], index: 0, kind: input, shape index: {}]   ;;  %s3055_s1 = inlined_call_operand.vmem [shape: f32[1,300], index: 1, kind: input, shape index: {}]   ;;  %s3056_s2 = inlined_call_operand.vmem [shape: f32[1,300], index: 2, kind: input, shape index: {}]   ;;  %s3057_s3 = inlined_call_operand.hbm [shape: bf16[300,256], index: 3, kind: input, shape index: {}]   ;;  %s3058_s4 = inlined_call_operand.vmem [shape: f32[1,256], index: 4, kind: input, shape index: {}]   ;;  %s3059_s5 = inlined_call_operand.hbm [shape: bf16[256,128], index: 5, kind: input, shape index: {}]   ;;  %s3060_s6 = inlined_call_operand.vmem [shape: f32[1,128], index: 6, kind: input, shape index: {}]   ;;  %s3061_s7 = inlined_call_operand.vmem [shape: bf16[128,64], index: 7, kind: input, shape index: {}]   ;;  %s3062_s8 = inlined_call_operand.vmem [shape: f32[1,64], index: 8, kind: input, shape index: {}]   ;;  %s3063_s9 = inlined_call_operand.vmem [shape: bf16[8,64], index: 9, kind: input, shape index: {}]   ;;  %s3064_s10 = inlined_call_operand.<no memory space> [shape: f32[1,1], index: 10, kind: input, shape index: {}]   ;;  %s3065_s11 = inlined_call_operand.vmem [shape: f32[8,200], index: 11, kind: output, shape index: {}]  }
   0x1   :  { %3071 = sst [smem:[#allocation12_spill]] %s3065_s11  ;;  %v16_v0 = vstv %s3064_s10 }
   0x2   :  { %17 = vst [vmem:[#allocation2] sm:$0x1] %v16_v0 }
   0x3   :  { %18 = vsyncpa [#allocation4], 0 }
   0x4   :  { %20 = vsyncpa [#allocation4 + $0x1], 0 }
   0x5   :  { %21 = vsyncpa [#allocation6], 0  ;;  %s2454_s19 = smov 0   ;;  %s2456_s20 = smov 0  }
   0x6   :  { %s2458_s21 = smov 0   ;;  %s2460_s22 = smov 0  }
   0x7 LB: > { %s2473_s10 = sadd.s32 4294967295, %s2377_s22   ;;  %s2476_s23 = sadd.s32 1, %s2377_s22   ;;  %s2377_s22 = sphi %s2460_s22, %s3084_s22   ;;  %s2373_s21 = sphi %s2458_s21, %s3088_s21   ;;  %s2369_s20 = sphi %s2456_s20, %s3087_s20   ;;  %s2365_s19 = sphi %s2454_s19, %s3086_s19  }
   0x8   : > { %3072 = sst [smem:[#allocation10_spill]] %s2476_s23  ;;  %s31_s24 = ssub.s32 %s2377_s22, %s2476_s23 }
   0x9   : > { %s34_s25 = sadd.s32 1, %s2373_s21  ;;  %p32_p0 = scmp.eq.s32.totalorder %s31_s24, 0 }
   0xa   : > { %p41_p1 = scmp.ne.s32.totalorder %s2373_s21, %s2369_s20  ;;  %p42_p2 = scmp.eq.s32.totalorder %s2377_s22, 0 }
   0xb   : > { %p47_p3 = scmp.ne.s32.totalorder %s2369_s20, %s2365_s19  ;;  %p3066_p5 = scmp.eq.s32.totalorder %s2473_s10, 0 }
   0xc   : > { %s2486_s26 = scalar_select %p32_p0, %s2373_s21, %s34_s25  }
   0xd   : > { %p2488_p4 = por %p42_p2, %p41_p1  ;;  %p1810_p6 = scmp.ge.s32.totalorder %s2377_s22, 1 }
   0xe   : > { %3073 = sst [smem:[#allocation11_spill]] %s2486_s26  ;;  %p294_p7 = scmp.lt.s32.totalorder %s2377_s22, 3 }
   0xf   : > { %s3074_s27 = scalar_select %p2488_p4, 1, 0 }
  0x10   : > { %p2497_p8 = por %p3066_p5, %p47_p3  ;;  %p2501_p9 = pnand %p1810_p6, %p294_p7 }
  0x11   : > { %s2379_s30 = smov [#allocation5]   ;;  %s2380_s14 = smov [#allocation7]  }
  0x12   : > { %s3075_s28 = scalar_select %p2497_p8, 1, 0 }
  0x13   : > { %s3076_s29 = scalar_select %p2501_p9, 1, 0 }
  0x14   : > { %s312_s12 = sshll.u32 %s2379_s30, 4  ;;  %p2119_p10 = pneg %p2501_p9  ;;  %s313_s12 = int_to_ptr.vmem [resolvable:$true] %s312_s12 }
  0x15   : > { %s328_s15 = sshll.u32 %s2380_s14, 4  ;;  %s2255_s18 = scalar_lea.hbm %s3057_s3, 4864  ;;  %s2513_s15 = int_to_ptr.vmem [resolvable:$true] %s328_s15 }
  0x16   : > { %p2509_p11 = pnand %p2119_p10, %p3066_p5  ;;  %p2256_p12 = scmp.ne.s32.totalorder %s3057_s3, %s2255_s18 }
  0x17   : > { %p2262_p2 = scmp.lt.u32.totalorder %s2255_s18, %s3057_s3 }
  0x18   : > { %p2257_p13 = pneg %p2509_p11 }
  0x1a   : > { %p2258_p0 = pnand %p2257_p13, %p2256_p12 }
  0x1c   : > { %p2259_p1 = pneg %p2258_p0 }
  0x1e   : > { %p2264_p3 = pnand %p2262_p2, %p2259_p1 }
  0x20   : > { %2267 = shalt.err (!%p2264_p3)
}
  0x21   : > { %s2268_s14 = scalar_lea.vmem %s313_s12, 4864  ;;  %p2276_p5 = scmp.lt.s32.totalorder %s313_s12, %s313_s12 }
  0x22   : > { %p2269_p6 = scmp.ne.s32.totalorder %s313_s12, %s2268_s14  ;;  %p2277_p8 = scmp.lt.s32.totalorder %s2268_s14, %s2268_s14 }
  0x24   : > { %p2271_p7 = pnand %p2269_p6, %p2257_p13  ;;  %p2278_p9 = por %p2277_p8, %p2276_p5 }
  0x26   : > { %p2272_p10 = pneg %p2271_p7 }
  0x28   : > { %p2279_p4 = pnand %p2278_p9, %p2272_p10 }
  0x2a   : > { %2282 = shalt.err (!%p2279_p4)
}
  0x2b   : > { %s2381_s16 = smov 128   ;;  %s2382_s17 = smov 8  }
  0x2c   : > { %2122 = dma.hbm_to_vmem [thread:$0]  (!%p2509_p11), %s3057_s3, 4864, %s313_s12, [#allocation6], %s2381_s16, %s2381_s16, %s2382_s17  }
  0x2d   : > { %s2283_s30 = scalar_lea.hbm %s3059_s5, 2048 }
  0x2e   : > { %p2284_p12 = scmp.ne.s32.totalorder %s3059_s5, %s2283_s30  ;;  %p2290_p8 = scmp.lt.u32.totalorder %s2283_s30, %s3059_s5 }
  0x30   : > { %p2286_p4 = pnand %p2284_p12, %p2257_p13 }
  0x32   : > { %p2287_p5 = pneg %p2286_p4 }
  0x34   : > { %p2292_p9 = pnand %p2290_p8, %p2287_p5 }
  0x36   : > { %2295 = shalt.err (!%p2292_p9)
}
  0x37   : > { %s2296_s12 = scalar_lea.vmem %s2513_s15, 2048  ;;  %p2304_p3 = scmp.lt.s32.totalorder %s2513_s15, %s2513_s15 }
  0x38   : > { %p2297_p0 = scmp.ne.s32.totalorder %s2513_s15, %s2296_s12  ;;  %p2305_p6 = scmp.lt.s32.totalorder %s2296_s12, %s2296_s12 }
  0x3a   : > { %p2299_p1 = pnand %p2297_p0, %p2257_p13  ;;  %p2306_p7 = por %p2305_p6, %p2304_p3 }
  0x3c   : > { %p2300_p2 = pneg %p2299_p1 }
  0x3e   : > { %p2307_p10 = pnand %p2306_p7, %p2300_p2 }
  0x40   : > { %2310 = shalt.err (!%p2307_p10)
}
  0x41   : > { %s2383_s11 = smov 64   ;;  %s2384_s23 = smov 4  }
  0x42   : > { %2125 = dma.hbm_to_vmem [thread:$0]  (!%p2509_p11), %s3059_s5, 2048, %s2513_s15, [#allocation6], %s2383_s11, %s2383_s11, %s2384_s23  }
  0x43   : > { %p1813_p12 = scmp.ge.s32.totalorder %s2377_s22, 2 }
  0x44   : > { %p3078_p13 = scmp.ne.s32.totalorder (!%p1813_p12), %s3074_s27, 0 }
  0x45   : > { %353 = sbr.rel (%p1813_p12) target bundleno = 112 (0x70), region = 56 }
  0x4c   : > { %356 = sbr.rel (!%p3078_p13) target bundleno = 112 (0x70), region = 60  ;;  %s357_s17 = sand.u32 (%p3078_p13), 1, %s2373_s21  }
  0x4d   : > { %s1814_s18 = sshll.u32 (%p3078_p13), %s2377_s22, 4  ;;  %s2107_s19 = smul.u32 (%p3078_p13), 384, %s357_s17 }
  0x4e   : > { %s363_s24 = ssub.s32 (%p3078_p13), 25, %s1814_s18  ;;  %s2570_s30 = scalar_lea.sflag (%p3078_p13), [#allocation4], %s357_s17 }
  0x4f   : > { %p364_p4 = scmp.lt.s32.totalorder (%p3078_p13), %s363_s24, 16  ;;  %s361_s15 = scalar_lea.vmem (%p3078_p13), [#allocation3], %s2107_s19 }
  0x53   : > { %s3090_s24 = smov (!%p364_p4, %s363_s24), 16 }
  0x54   : > { %s2567_s25 = smul.u32 384, %s3090_s24 }
  0x56   : > { %s369_s13 = ssub.s32 6144, %s2567_s25 }
  0x57   : > { %370 = vsyncadd %s2570_s30, %s369_s13  ;;  %p1817_p11 = scmp.ne.s32.totalorder %s2567_s25, 0  ;;  %s2108_s27 = smul.u32 6144, %s2377_s22 }
  0x58   : > { %s376_s14 = sshll.u32 %s361_s15, 4  ;;  %s2315_s22 = scalar_lea.hbm %s3054_s0, 9600  ;;  %s2580_s14 = int_to_ptr.vmem [resolvable:$true] %s376_s14 }
  0x59   : > { %s2578_s23 = scalar_lea.hbm %s3054_s0, %s2108_s27 }
  0x5a   : > { %s2311_s26 = scalar_lea.hbm %s2578_s23, %s2567_s25  ;;  %p2316_p0 = scmp.lt.u32.totalorder %s2578_s23, %s3054_s0 }
  0x5b   : > { %p2312_p5 = scmp.ne.s32.totalorder %s2578_s23, %s2311_s26  ;;  %p2317_p1 = scmp.lt.u32.totalorder %s2315_s22, %s2311_s26 }
  0x5c   : > { %p2319_p3 = scmp.lt.u32.totalorder %s2311_s26, %s2578_s23 }
  0x5d   : > { %p2313_p8 = pnand %p2312_p5, %p1817_p11  ;;  %p2318_p2 = por %p2317_p1, %p2316_p0 }
  0x5f   : > { %p2314_p9 = pneg %p2313_p8  ;;  %p2320_p6 = por %p2319_p3, %p2318_p2 }
  0x61   : > { %p2321_p7 = pnand %p2320_p6, %p2314_p9 }
  0x63   : > { %2324 = shalt.err (!%p2321_p7)
}
  0x64   : > { %s2325_s24 = scalar_lea.vmem %s2580_s14, %s2567_s25  ;;  %s2385_s13 = smov [#allocation3]  }
  0x65   : > { %p2326_p10 = scmp.ne.s32.totalorder %s2580_s14, %s2325_s24  ;;  %s2329_s15 = sshll.u32 %s2385_s13, 4  ;;  %s2330_s15 = int_to_ptr.vmem [resolvable:$false] %s2329_s15 }
  0x66   : > { %s2331_s27 = scalar_lea.vmem %s2330_s15, 12288  ;;  %p2332_p4 = scmp.lt.s32.totalorder %s2580_s14, %s2330_s15 }
  0x67   : > { %p2327_p12 = pnand %p2326_p10, %p1817_p11  ;;  %p2333_p5 = scmp.lt.s32.totalorder %s2331_s27, %s2325_s24 }
  0x69   : > { %p2328_p13 = pneg %p2327_p12  ;;  %p2334_p8 = por %p2333_p5, %p2332_p4 }
  0x6b   : > { %p2335_p0 = pnand %p2334_p8, %p2328_p13 }
  0x6d   : > { %2338 = shalt.err (!%p2335_p0)
}
  0x6e   : > { %s2386_s12 = smov 384   ;;  %s2387_s11 = smov 24  }
  0x6f   : > { %382 = dma.hbm_to_vmem [thread:$0]  (%p1817_p11), %s2578_s23, %s2567_s25, %s2580_s14, %s2570_s30, %s2386_s12, %s2386_s12, %s2387_s11  }
  0x70 PF: > { %p3079_p9 = scmp.ne.s32.totalorder %s3076_s29, 0 }
  0x71   : > { %s390_s26 = sand.u32 (!%p3079_p9), 1, %s2369_s20   ;;  %p3080_p1 = scmp.ne.s32.totalorder (!%p3079_p9), %s3075_s28, 0 }
  0x72   : > { %388 = sbr.rel (%p3079_p9) target bundleno = 1207 (0x4b7), region = 64  ;;  %s391_s17 = scalar_lea.sflag (!%p3079_p9), [#allocation4], %s390_s26 }
  0x73   : > { %s2109_s16 = smul.u32 (!%p3079_p9), 384, %s390_s26 }
  0x75   : > { %s2610_s22 = scalar_lea.vmem (!%p3079_p9), [#allocation3], %s2109_s16 }
  0x79   : > { %2356 = dma.done.wait (%p3080_p1), %s391_s17, 6144  }
  0x7a   : > { %2358 = vsyncadd (%p3080_p1), %s391_s17, 4294961152  ;;  %p3081_p2 = scmp.eq.s32.totalorder %s2473_s10, 0 }
  0x7c   : > { %2360 = dma.done.wait (%p3081_p2), [#allocation6], 6912   ;;  %p3082_p11 = pmov %p3081_p2 }
  0x7d   : > { %v2388_v1 = vmov 0   ;;  %v2174_v2 = vld [vmem:[#allocation5 + $0x4] ss:$8 sps:$4 sm:$0xff]   ;;  %v2176_v3 = vld [vmem:[#allocation5] ss:$8 sps:$4 sm:$0xff]   ;;  %v501_v10 = vlaneseq  ;;  %v482_v38 = vld [vmem:[%s2610_s22 + $0xf8] sm:$0xff] }
  0x7e   : > { %2362 = vsyncadd (%p3082_p11), [#allocation6], 4294960384  ;;  %2173 = vset.pattern.permute.xlu0 %v2388_v1  ;;  %923 = vmatprep.subr.bf16.mxu0 %v2174_v2  ;;  %v2177_v4 = vld [vmem:[#allocation5 + $0x14] ss:$8 sps:$4 sm:$0xff]   ;;  %v2179_v5 = vld [vmem:[#allocation5 + $0x10] ss:$8 sps:$4 sm:$0xff]  }
  0x7f   : > { %924 = vmatpush1.bf16.msra.mxu0 %v2176_v3  ;;  %v2180_v6 = vld [vmem:[#allocation5 + $0x24] ss:$8 sps:$4 sm:$0xff]   ;;  %v2182_v7 = vld [vmem:[#allocation5 + $0x20] ss:$8 sps:$4 sm:$0xff]   ;;  %v2183_v8 = vld [vmem:[#allocation5 + $0x34] ss:$8 sps:$4 sm:$0xff]  }
  0x80   : > { %925 = vmatprep.subr.bf16.mxu0 %v2177_v4  ;;  %v2185_v9 = vld [vmem:[#allocation5 + $0x30] ss:$8 sps:$4 sm:$0xff]   ;;  %v2186_v11 = vld [vmem:[#allocation5 + $0x44] ss:$8 sps:$4 sm:$0xff]   ;;  %v2188_v12 = vld [vmem:[#allocation5 + $0x40] ss:$8 sps:$4 sm:$0xff]  }
  0x81   : > { %v502_v13 = vshrl.u32 %v501_v10, 7  ;;  %v2189_v14 = vld [vmem:[#allocation5 + $0x54] ss:$8 sps:$4 sm:$0xff]   ;;  %v2191_v15 = vld [vmem:[#allocation5 + $0x50] ss:$8 sps:$4 sm:$0xff]   ;;  %v452_v19 = vld [vmem:[%s2610_s22 + $0x8] sm:$0xff] }
  0x82   : > { %v2192_v18 = vld [vmem:[#allocation5 + $0x64] ss:$8 sps:$4 sm:$0xff]   ;;  %v2628_v21 = vld [vmem:[%s3055_s1] sm:$0x7]  ;;  %v2197_v31 = vld [vmem:[#allocation5 + $0x70] ss:$8 sps:$4 sm:$0xff]  }
  0x83   : > { %926 = vmatpush1.bf16.msra.mxu0 %v2179_v5  ;;  %v2621_v16 = vsub.s32 1, %v502_v13  ;;  %v511_v17 = vsub.s32 2, %v502_v13  ;;  %v455_v20 = vld [vmem:[%s2610_s22 + $0x20] sm:$0xff]  ;;  %v2195_v28 = vld [vmem:[#allocation5 + $0x74] ss:$8 sps:$4 sm:$0xff]   ;;  %v488_v43 = vld [vmem:[%s2610_s22 + $0x128] sm:$0xff] }
  0x84   : > { %927 = vmatprep.subr.bf16.mxu0 %v2180_v6  ;;  %v2633_v22 = vld [vmem:[%s3056_s2] sm:$0x7]  ;;  %v2198_v34 = vld [vmem:[#allocation5 + $0x84] ss:$8 sps:$4 sm:$0xff]   ;;  %v485_v39 = vld [vmem:[%s2610_s22 + $0x110] sm:$0xff]  ;;  %v2669_v54 = vsub.s32 0, %v502_v13 }
  0x85   : > { %v2194_v23 = vld [vmem:[#allocation5 + $0x60] ss:$8 sps:$4 sm:$0xff]   ;;  %v2637_v24 = vrot.slane %v2628_v21, %v2621_v16  ;;  %v2640_v25 = vrot.slane %v2628_v21, %v511_v17  ;;  %v2644_v26 = vrot.slane %v2633_v22, %v2621_v16  ;;  %v2647_v27 = vrot.slane %v2633_v22, %v511_v17  ;;  %v2201_v37 = vld [vmem:[#allocation5 + $0x94] ss:$8 sps:$4 sm:$0xff]   ;;  %v2203_v40 = vld [vmem:[#allocation5 + $0x90] ss:$8 sps:$4 sm:$0xff]  }
  0x86   : > { %v2200_v36 = vld [vmem:[#allocation5 + $0x80] ss:$8 sps:$4 sm:$0xff]   ;;  %v2204_v41 = vld [vmem:[#allocation5 + $0xa4] ss:$8 sps:$4 sm:$0xff]   ;;  %v494_v48 = vld [vmem:[%s2610_s22 + $0x158] sm:$0xff]  ;;  %v2704_v17 = vrot.slane %v2628_v21, %v2669_v54  ;;  %vm916_vm0 = vcmask 1045504  }
  0x87   : > { %928 = vmatpush1.bf16.msra.mxu0 %v2182_v7  ;;  %v517_v29 = vmul.f32 %v2637_v24, %v452_v19  ;;  %v520_v30 = vmul.f32 %v2637_v24, %v455_v20  ;;  %v547_v42 = vmul.f32 %v2637_v24, %v482_v38  ;;  %v550_v44 = vmul.f32 %v2637_v24, %v485_v39  ;;  %v491_v45 = vld [vmem:[%s2610_s22 + $0x140] sm:$0xff]  ;;  %v2207_v49 = vld [vmem:[#allocation5 + $0xb4] ss:$8 sps:$4 sm:$0xff]   ;;  %v456_v56 = vld [vmem:[%s2610_s22 + $0x28] sm:$0xff]  ;;  %p446_p3 = scmp.lt.s32.totalorder %s2473_s10, 1  ;;  %s3083_s11 = sld [smem:[#allocation12_spill]] }
  0x88   : > { %929 = vmatprep.subr.bf16.mxu0 %v2183_v8  ;;  %v2206_v46 = vld [vmem:[#allocation5 + $0xa0] ss:$8 sps:$4 sm:$0xff]   ;;  %v553_v51 = vmul.f32 %v2637_v24, %v488_v43  ;;  %v497_v52 = vld [vmem:[%s2610_s22 + $0x170] sm:$0xff]  ;;  %v556_v55 = vmul.f32 %v2637_v24, %v491_v45  ;;  %v559_v61 = vmul.f32 %v2637_v24, %v494_v48  ;;  %v462_v62 = vld [vmem:[%s2610_s22 + $0x58] sm:$0xff]  ;;  %vm891_vm1 = vcmask 359424  }
  0x89   : > { %v582_v32 = vadd.f32 %v2644_v26, %v517_v29  ;;  %v585_v33 = vadd.f32 %v2644_v26, %v520_v30  ;;  %v2660_v47 = vadd.f32 %v2644_v26, %v547_v42  ;;  %v2664_v50 = vadd.f32 %v2644_v26, %v550_v44  ;;  %v453_v53 = vld [vmem:[%s2610_s22 + $0x10] sm:$0xff]  ;;  %v459_v57 = vld [vmem:[%s2610_s22 + $0x40] sm:$0xff]  ;;  %v458_v0 = vld [vmem:[%s2610_s22 + $0x38] sm:$0xff]  ;;  %s3092_s10 = smov (!%p446_p3, %s2473_s10), 1 }
  0x8a   : > { %v2209_v58 = vld [vmem:[#allocation5 + $0xb0] ss:$8 sps:$4 sm:$0xff]   ;;  %v2677_v60 = vadd.f32 %v2644_v26, %v553_v51  ;;  %v2210_v63 = vld [vmem:[#allocation5 + $0xc4] ss:$8 sps:$4 sm:$0xff]   ;;  %v2683_v2 = vadd.f32 %v2644_v26, %v556_v55  ;;  %v562_v3 = vmul.f32 %v2637_v24, %v497_v52  ;;  %v2689_v6 = vadd.f32 %v2644_v26, %v559_v61  ;;  %s1824_s15 = sshll.u32 %s3092_s10, 3 }
  0x8b   : > { %930 = vmatpush1.bf16.msra.mxu0 %v2185_v9  ;;  %v630_v35 = vpack.c.bf16 %v585_v33, %v582_v32  ;;  %v645_v59 = vpack.c.bf16 %v2664_v50, %v2660_v47  ;;  %v465_v4 = vld [vmem:[%s2610_s22 + $0x70] sm:$0xff]  ;;  %v468_v5 = vld [vmem:[%s2610_s22 + $0x88] sm:$0xff]  ;;  %v471_v7 = vld [vmem:[%s2610_s22 + $0xa0] sm:$0xff]  ;;  %v524_v19 = vmul.f32 %v2640_v25, %v459_v57  ;;  %v527_v21 = vmul.f32 %v2640_v25, %v462_v62 }
  0x8c   : > { %931 = vmatprep.subr.bf16.mxu0 %v2186_v11  ;;  %v474_v8 = vld [vmem:[%s2610_s22 + $0xb8] sm:$0xff]  ;;  %v648_v9 = vpack.c.bf16 %v2683_v2, %v2677_v60  ;;  %v2696_v10 = vadd.f32 %v2644_v26, %v562_v3  ;;  %v518_v11 = vmul.f32 %v2640_v25, %v453_v53  ;;  %v477_v13 = vld [vmem:[%s2610_s22 + $0xd0] sm:$0xff]  ;;  %v483_v20 = vld [vmem:[%s2610_s22 + $0x100] sm:$0xff]  ;;  %v530_v33 = vmul.f32 %v2640_v25, %v465_v4 }
  0x8d   : > { %955 = vmatprep.mubr.bf16.mxu0 %v630_v35  ;;  %v2724_v32 = vadd.f32 %v2647_v27, %v524_v19  ;;  %v489_v35 = vld [vmem:[%s2610_s22 + $0x130] sm:$0xff]  ;;  %v2733_v38 = vadd.f32 %v2647_v27, %v527_v21  ;;  %v536_v39 = vmul.f32 %v2640_v25, %v471_v7  ;;  %v451_v42 = vld [vmem:[%s2610_s22] sm:$0xff]  ;;  %v454_v43 = vld [vmem:[%s2610_s22 + $0x18] sm:$0xff]  ;;  %vm2390_vm2 = vmmov 0   ;;  %s449_s26 = scalar_lea.vmem %s3083_s11, %s1824_s15 }
  0x8e   : > { %v2715_v29 = vadd.f32 %v2647_v27, %v518_v11  ;;  %v2740_v44 = vadd.f32 %v2647_v27, %v530_v33  ;;  %v461_v51 = vld [vmem:[%s2610_s22 + $0x50] sm:$0xff]  ;;  %v516_v19 = vmul.f32 %v2704_v17, %v451_v42  ;;  %v2242_v60 = vld [vmem:[#allocation7 + $0x28] sm:$0xff]   ;;  %v2243_v2 = vld [vmem:[#allocation7 + $0x70] sm:$0xff]   ;;  %vm1656_vm3 = vcmask 523264  }
  0x8f   : > { %932 = vmatpush1.bf16.msra.mxu0 %v2188_v12  ;;  %v521_v12 = vmul.f32 %v2640_v25, %v456_v56  ;;  %v634_v52 = vpack.c.bf16 %v2733_v38, %v2724_v32  ;;  %v2751_v53 = vadd.f32 %v2647_v27, %v536_v39  ;;  %v548_v56 = vmul.f32 %v2640_v25, %v483_v20  ;;  %v2232_v42 = vld [vmem:[#allocation7] sm:$0xff]  }
  0x90   : > { %933 = vmatprep.subr.bf16.mxu0 %v2189_v14  ;;  %v480_v14 = vld [vmem:[%s2610_s22 + $0xe8] sm:$0xff]  ;;  %v519_v20 = vmul.f32 %v2704_v17, %v454_v43  ;;  %v2233_v43 = vld [vmem:[#allocation7 + $0x48] sm:$0xff]  }
  0x91   : > { %v2718_v30 = vadd.f32 %v2647_v27, %v521_v12  ;;  %v545_v48 = vmul.f32 %v2640_v25, %v480_v14  ;;  %v2771_v4 = vadd.f32 %v2647_v27, %v548_v56  ;;  %v2224_v56 = vld [vmem:[#allocation5 + $0x104] ss:$8 sps:$4 sm:$0xff]  }
  0x93   : > { %934 = vmatpush1.bf16.msra.mxu0 %v2191_v15  ;;  %v2212_v15 = vld [vmem:[#allocation5 + $0xc0] ss:$8 sps:$4 sm:$0xff]   ;;  %v2763_v61 = vadd.f32 %v2647_v27, %v545_v48 }
  0x94   : > { %935 = vmatprep.subr.bf16.mxu0 %v2192_v18  ;;  %v2708_v18 = vrot.slane %v2633_v22, %v2669_v54  ;;  %v523_v22 = vmul.f32 %v2637_v24, %v458_v0  ;;  %v498_v0 = vld [vmem:[%s2610_s22 + $0x178] sm:$0xff] }
  0x95   : > { %v563_v14 = vmul.f32 %v2640_v25, %v498_v0  ;;  %v2234_v0 = vld [vmem:[#allocation7 + $0x8] sm:$0xff]  }
  0x96   : > { %v581_v39 = vadd.f32 %v2708_v18, %v516_v19 }
  0x97   : > { %936 = vmatpush1.bf16.msra.mxu0 %v2194_v23  ;;  %v2213_v23 = vld [vmem:[#allocation5 + $0xd4] ss:$8 sps:$4 sm:$0xff]  }
  0x98   : > { %937 = vmatprep.subr.bf16.mxu0 %v2195_v28  ;;  %v651_v28 = vpack.c.bf16 %v2696_v10, %v2689_v6  ;;  %v2244_v6 = vld [vmem:[#allocation7 + $0x30] sm:$0xff]   ;;  %v2246_v10 = vld [vmem:[#allocation7 + $0x38] sm:$0xff]  }
  0x9b   : > { %938 = vmatpush1.bf16.msra.mxu0 %v2197_v31  ;;  %v486_v31 = vld [vmem:[%s2610_s22 + $0x118] sm:$0xff] }
  0x9c   : > { %939 = vmatprep.subr.bf16.mxu0 %v2198_v34  ;;  %v533_v34 = vmul.f32 %v2640_v25, %v468_v5  ;;  %v551_v62 = vmul.f32 %v2640_v25, %v486_v31  ;;  %v554_v5 = vmul.f32 %v2640_v25, %v489_v35  ;;  %v526_v31 = vmul.f32 %v2637_v24, %v461_v51  ;;  %v460_v51 = vld [vmem:[%s2610_s22 + $0x48] sm:$0xff] }
  0x9e   : > { %v2743_v45 = vadd.f32 %v2647_v27, %v533_v34  ;;  %v2778_v12 = vadd.f32 %v2647_v27, %v551_v62  ;;  %v2797_v34 = vadd.f32 %v2647_v27, %v563_v14  ;;  %v591_v48 = vadd.f32 %v2644_v26, %v526_v31  ;;  %v464_v62 = vld [vmem:[%s2610_s22 + $0x68] sm:$0xff]  ;;  %v2236_v31 = vld [vmem:[#allocation7 + $0x10] sm:$0xff]  }
  0x9f   : > { %940 = vmatpush1.bf16.msra.mxu0 %v2200_v36  ;;  %v492_v36 = vld [vmem:[%s2610_s22 + $0x148] sm:$0xff] }
  0xa0   : > { %941 = vmatprep.subr.bf16.mxu0 %v2201_v37  ;;  %v631_v37 = vpack.c.bf16 %v2718_v30, %v2715_v29  ;;  %v637_v57 = vpack.c.bf16 %v2743_v45, %v2740_v44  ;;  %v557_v7 = vmul.f32 %v2640_v25, %v492_v36  ;;  %v646_v33 = vpack.c.bf16 %v2778_v12, %v2771_v4 }
  0xa2   : > { %v2788_v21 = vadd.f32 %v2647_v27, %v557_v7 }
  0xa3   : > { %942 = vmatpush1.bf16.msra.mxu0 %v2203_v40  ;;  %v539_v40 = vmul.f32 %v2640_v25, %v474_v8  ;;  %v2218_v8 = vld [vmem:[#allocation5 + $0xe0] ss:$8 sps:$4 sm:$0xff]  }
  0xa4   : > { %943 = vmatprep.subr.bf16.mxu0 %v2204_v41  ;;  %v2215_v41 = vld [vmem:[#allocation5 + $0xd0] ss:$8 sps:$4 sm:$0xff]  }
  0xa5   : > { %v2754_v55 = vadd.f32 %v2647_v27, %v539_v40  ;;  %v584_v40 = vadd.f32 %v2708_v18, %v519_v20  ;;  %v2227_v20 = vld [vmem:[#allocation5 + $0x114] ss:$8 sps:$4 sm:$0xff]  }
  0xa7   : > { %944 = vmatpush1.bf16.msra.mxu0 %v2206_v46  ;;  %v542_v46 = vmul.f32 %v2640_v25, %v477_v13  ;;  %v640_v3 = vpack.c.bf16 %v2754_v55, %v2751_v53 }
  0xa8   : > { %945 = vmatprep.subr.bf16.mxu0 %v2207_v49  ;;  %v2216_v49 = vld [vmem:[#allocation5 + $0xe4] ss:$8 sps:$4 sm:$0xff]  }
  0xab   : > { %946 = vmatpush1.bf16.msra.mxu0 %v2209_v58  ;;  %v2760_v58 = vadd.f32 %v2647_v27, %v542_v46  ;;  %v2221_v46 = vld [vmem:[#allocation5 + $0xf0] ss:$8 sps:$4 sm:$0xff]  }
  0xac   : > { %947 = vmatprep.subr.bf16.mxu0 %v2210_v63  ;;  %v495_v63 = vld [vmem:[%s2610_s22 + $0x160] sm:$0xff] }
  0xad   : > { %v643_v11 = vpack.c.bf16 %v2763_v61, %v2760_v58  ;;  %v560_v13 = vmul.f32 %v2640_v25, %v495_v63  ;;  %v467_v63 = vld [vmem:[%s2610_s22 + $0x80] sm:$0xff] }
  0xae   : > { %v532_v19 = vmul.f32 %v2637_v24, %v467_v63  ;;  %v2238_v63 = vld [vmem:[#allocation7 + $0x18] sm:$0xff]  }
  0xaf   : > { %948 = vmatpush1.bf16.msra.mxu0 %v2212_v15  ;;  %v2219_v15 = vld [vmem:[#allocation5 + $0xf4] ss:$8 sps:$4 sm:$0xff]   ;;  %v2794_v25 = vadd.f32 %v2647_v27, %v560_v13  ;;  %v2222_v13 = vld [vmem:[#allocation5 + $0x100] ss:$8 sps:$4 sm:$0xff]  }
  0xb0   : > { %949 = vmatprep.subr.bf16.mxu0 %v2213_v23  ;;  %v2785_v23 = vadd.f32 %v2647_v27, %v554_v5  ;;  %v588_v27 = vadd.f32 %v2644_v26, %v523_v22  ;;  %v629_v5 = vpack.c.bf16 %v584_v40, %v581_v39  ;;  %v2235_v22 = vld [vmem:[#allocation7 + $0x50] sm:$0xff]  }
  0xb1   : > { %v652_v36 = vpack.c.bf16 %v2797_v34, %v2794_v25 }
  0xb2   : > { %v649_v35 = vpack.c.bf16 %v2788_v21, %v2785_v23  ;;  %v633_v14 = vpack.c.bf16 %v591_v48, %v588_v27  ;;  %v597_v27 = vadd.f32 %v2644_v26, %v532_v19  ;;  %v2225_v48 = vld [vmem:[#allocation5 + $0x110] ss:$8 sps:$4 sm:$0xff]  }
  0xb3   : > { %950 = vmatpush1.bf16.msra.mxu0 %v2215_v41  ;;  %v2231_v41 = vld [vmem:[#allocation7 + $0x40] sm:$0xff]  }
  0xb4   : > { %951 = vmatprep.subr.bf16.mxu0 %v2216_v49  ;;  %v457_v49 = vld [vmem:[%s2610_s22 + $0x30] sm:$0xff]  ;;  %1902 = vmatprep.subr.bf16.mxu1 %v2231_v41  ;;  %v463_v41 = vld [vmem:[%s2610_s22 + $0x60] sm:$0xff] }
  0xb5   : > { %1903 = vmatpush3.bf16.msra.mxu1 %v2232_v42  ;;  %v522_v7 = vmul.f32 %v2704_v17, %v457_v49  ;;  %v466_v42 = vld [vmem:[%s2610_s22 + $0x78] sm:$0xff]  ;;  %v2240_v19 = vld [vmem:[#allocation7 + $0x20] sm:$0xff]  }
  0xb6   : > { %1904 = vmatprep.subr.bf16.mxu1 %v2233_v43  ;;  %v2237_v43 = vld [vmem:[#allocation7 + $0x58] sm:$0xff]   ;;  %v470_v49 = vld [vmem:[%s2610_s22 + $0x98] sm:$0xff] }
  0xb7   : > { %952 = vmatpush1.bf16.msra.mxu0 %v2218_v8  ;;  %v525_v8 = vmul.f32 %v2704_v17, %v460_v51  ;;  %v587_v39 = vadd.f32 %v2708_v18, %v522_v7  ;;  %v473_v51 = vld [vmem:[%s2610_s22 + $0xb0] sm:$0xff]  ;;  %v531_v7 = vmul.f32 %v2704_v17, %v466_v42 }
  0xb8   : > { %953 = vmatprep.subr.bf16.mxu0 %v2219_v15  ;;  %v529_v15 = vmul.f32 %v2637_v24, %v464_v62  ;;  %v2230_v62 = vld [vmem:[#allocation5 + $0x120] ss:$8 sps:$4 sm:$0x3f]   ;;  %v469_v42 = vld [vmem:[%s2610_s22 + $0x90] sm:$0xff] }
  0xb9   : > { %1905 = vmatpush3.bf16.msra.mxu1 %v2234_v0  ;;  %v590_v40 = vadd.f32 %v2708_v18, %v525_v8  ;;  %v2239_v8 = vld [vmem:[#allocation7 + $0x60] sm:$0xff]  }
  0xba   : > { %1906 = vmatprep.subr.bf16.mxu1 %v2235_v22 }
  0xbb   : > { %954 = vmatpush1.bf16.msra.mxu0 %v2221_v46  ;;  %v594_v46 = vadd.f32 %v2644_v26, %v529_v15  ;;  %v632_v0 = vpack.c.bf16 %v590_v40, %v587_v39  ;;  %v918_v15 = vsel %vm916_vm0, %v2230_v62, 0  ;;  %v2241_v39 = vld [vmem:[#allocation7 + $0x68] sm:$0xff]  }
  0xbc   : > { %1036 = vmatprep.subr.bf16.mxu0 %v2224_v56  ;;  %v2228_v56 = vld [vmem:[#allocation5 + $0x124] ss:$8 sps:$4 sm:$0x3f]  }
  0xbd   : > { %1907 = vmatpush3.bf16.msra.mxu1 %v2236_v31  ;;  %v636_v22 = vpack.c.bf16 %v597_v27, %v594_v46  ;;  %v596_v31 = vadd.f32 %v2708_v18, %v531_v7  ;;  %v476_v46 = vld [vmem:[%s2610_s22 + $0xc8] sm:$0xff]  ;;  %v479_v27 = vld [vmem:[%s2610_s22 + $0xe0] sm:$0xff] }
  0xbe   : > { %956 = vmatmul.mubr.bf16.vlgmr.msra.gmra.mrb[0].mxu0 %v629_v5  ;;  %v528_v5 = vmul.f32 %v2704_v17, %v463_v41  ;;  %1908 = vmatprep.subr.bf16.mxu1 %v2237_v43  ;;  %v472_v43 = vld [vmem:[%s2610_s22 + $0xa8] sm:$0xff]  ;;  %v541_v62 = vmul.f32 %v2637_v24, %v476_v46 }
  0xbf   : > { %1037 = vmatpush1.bf16.msra.mxu0 %v2222_v13  ;;  %965 = vmatprep.mubr.bf16.mxu0 %v633_v14  ;;  %v535_v13 = vmul.f32 %v2637_v24, %v470_v49  ;;  %v538_v14 = vmul.f32 %v2637_v24, %v473_v51  ;;  %v534_v49 = vmul.f32 %v2704_v17, %v469_v42 }
  0xc0   : > { %1038 = vmatprep.subr.bf16.mxu0 %v2227_v20  ;;  %v593_v20 = vadd.f32 %v2708_v18, %v528_v5  ;;  %v537_v51 = vmul.f32 %v2704_v17, %v472_v43  ;;  %v606_v7 = vadd.f32 %v2644_v26, %v541_v62 }
  0xc1   : > { %1909 = vmatpush3.bf16.msra.mxu1 %v2238_v63  ;;  %v600_v40 = vadd.f32 %v2644_v26, %v535_v13  ;;  %v603_v41 = vadd.f32 %v2644_v26, %v538_v14  ;;  %v544_v63 = vmul.f32 %v2637_v24, %v479_v27  ;;  %v478_v13 = vld [vmem:[%s2610_s22 + $0xd8] sm:$0xff]  ;;  %v487_v27 = vld [vmem:[%s2610_s22 + $0x120] sm:$0xff] }
  0xc2   : > { %1910 = vmatprep.subr.bf16.mxu1 %v2239_v8  ;;  %v602_v5 = vadd.f32 %v2708_v18, %v537_v51  ;;  %v543_v24 = vmul.f32 %v2704_v17, %v478_v13  ;;  %v552_v51 = vmul.f32 %v2704_v17, %v487_v27 }
  0xc3   : > { %1039 = vmatpush1.bf16.msra.mxu0 %v2225_v48  ;;  %v635_v48 = vpack.c.bf16 %v596_v31, %v593_v20  ;;  %v609_v8 = vadd.f32 %v2644_v26, %v544_v63 }
  0xc4   : > { %1863 = vmatprep.subr.msk.bf16.mxu0 %vm916_vm0, %v2228_v56  ;;  %v639_v56 = vpack.c.bf16 %v603_v41, %v600_v40  ;;  %v608_v31 = vadd.f32 %v2708_v18, %v543_v24  ;;  %v484_v40 = vld [vmem:[%s2610_s22 + $0x108] sm:$0xff]  ;;  %v617_v62 = vadd.f32 %v2708_v18, %v552_v51 }
  0xc5   : > { %1911 = vmatpush3.bf16.msra.mxu1 %v2240_v19  ;;  %v642_v19 = vpack.c.bf16 %v609_v8, %v606_v7  ;;  %v549_v42 = vmul.f32 %v2704_v17, %v484_v40 }
  0xc6   : > { %966 = vmatmul.mubr.bf16.gmra.mrb[4].mxu0 %v632_v0  ;;  %1912 = vmatprep.subr.bf16.mxu1 %v2241_v39  ;;  %v599_v0 = vadd.f32 %v2708_v18, %v534_v49  ;;  %v481_v39 = vld [vmem:[%s2610_s22 + $0xf0] sm:$0xff] }
  0xc7   : > { %975 = vmatprep.mubr.bf16.mxu0 %v636_v22  ;;  %1041 = vmatpush1.bf16.msra.mxu0 %v918_v15  ;;  %v475_v22 = vld [vmem:[%s2610_s22 + $0xc0] sm:$0xff]  ;;  %v546_v26 = vmul.f32 %v2704_v17, %v481_v39  ;;  %v614_v46 = vadd.f32 %v2708_v18, %v549_v42  ;;  %v2250_v39 = vld [vmem:[%s3061_s7 + $0x18] sm:$0xff]  }
  0xc8   : > { %v638_v14 = vpack.c.bf16 %v602_v5, %v599_v0  ;;  %v540_v15 = vmul.f32 %v2704_v17, %v475_v22  ;;  %v493_v0 = vld [vmem:[%s2610_s22 + $0x150] sm:$0xff]  ;;  %v496_v5 = vld [vmem:[%s2610_s22 + $0x168] sm:$0xff] }
  0xc9   : > { %v611_v43 = vadd.f32 %v2708_v18, %v546_v26  ;;  %v558_v50 = vmul.f32 %v2704_v17, %v493_v0  ;;  %1913 = vmatpush3.bf16.msra.mxu1 %v2242_v60 }
  0xca   : > { %v605_v20 = vadd.f32 %v2708_v18, %v540_v15  ;;  %1914 = vmatprep.subr.bf16.mxu1 %v2243_v2 }
  0xcb   : > { %v644_v49 = vpack.c.bf16 %v614_v46, %v611_v43  ;;  %v623_v7 = vadd.f32 %v2708_v18, %v558_v50 }
  0xcc   : > { %v641_v41 = vpack.c.bf16 %v608_v31, %v605_v20 }
  0xcd   : > { %1915 = vmatpush3.bf16.msra.mxu1 %v2244_v6 }
  0xce   : > { %976 = vmatmul.mubr.bf16.gmra.mrb[8].mxu0 %v635_v48  ;;  %v490_v48 = vld [vmem:[%s2610_s22 + $0x138] sm:$0xff] }
  0xcf   : > { %985 = vmatprep.mubr.bf16.mxu0 %v639_v56  ;;  %v555_v56 = vmul.f32 %v2704_v17, %v490_v48  ;;  %v2251_v48 = vld [vmem:[%s3061_s7 + $0x20] sm:$0xff]  }
  0xd1   : > { %v620_v63 = vadd.f32 %v2708_v18, %v555_v56 }
  0xd3   : > { %v647_v47 = vpack.c.bf16 %v620_v63, %v617_v62 }
  0xd6   : > { %986 = vmatmul.mubr.bf16.gmra.mrb[12].mxu0 %v638_v14 }
  0xd7   : > { %995 = vmatprep.mubr.bf16.mxu0 %v642_v19 }
  0xde   : > { %996 = vmatmul.mubr.bf16.gmra.mrb[16].mxu0 %v641_v41 }
  0xdf   : > { %1005 = vmatprep.mubr.bf16.mxu0 %v645_v59  ;;  %v561_v59 = vmul.f32 %v2704_v17, %v496_v5  ;;  %v2247_v17 = vld [vmem:[%s3061_s7] sm:$0xff]  }
  0xe1   : > { %v626_v8 = vadd.f32 %v2708_v18, %v561_v59 }
  0xe3   : > { %v650_v22 = vpack.c.bf16 %v626_v8, %v623_v7 }
  0xe6   : > { %1006 = vmatmul.mubr.bf16.gmra.mrb[20].mxu0 %v644_v49 }
  0xe7   : > { %1015 = vmatprep.mubr.bf16.mxu0 %v648_v9  ;;  %v2245_v9 = vld [vmem:[#allocation7 + $0x78] sm:$0xff]  }
  0xe8   : > { %1916 = vmatprep.subr.bf16.mxu1 %v2245_v9 }
  0xe9   : > { %1917 = vmatpush3.bf16.msra.mxu1 %v2246_v10 }
  0xea   : > { %1991 = vmatprep.subr.bf16.mxu1 %v2247_v17 }
  0xee   : > { %1016 = vmatmul.mubr.bf16.gmra.mrb[24].mxu0 %v647_v47  ;;  %v2252_v47 = vld [vmem:[%s3061_s7 + $0x28] sm:$0xff]  }
  0xef   : > { %1025 = vmatprep.mubr.bf16.mxu0 %v651_v28 }
  0xf6   : > { %1026 = vmatmul.mubr.bf16.gmra.mrb[28].mxu0 %v650_v22 }
  0xf7   : > { %1068 = vmatprep.mubr.bf16.mxu0 %v2388_v1 }
  0xfe   : > { %1864 = vmatmul.mubr.msk.bf16.vlgmr.msra.gmra.mrb[0].mxu0 %vm891_vm1, %v631_v37 }
  0xff   : > { %1078 = vmatprep.mubr.bf16.mxu0 %v2388_v1 }
 0x106   : > { %1865 = vmatmul.mubr.msk.bf16.gmra.mrb[4].mxu0 %vm891_vm1, %v634_v52 }
 0x107   : > { %1088 = vmatprep.mubr.bf16.mxu0 %v2388_v1 }
 0x10e   : > { %1866 = vmatmul.mubr.msk.bf16.gmra.mrb[8].mxu0 %vm891_vm1, %v637_v57 }
 0x10f   : > { %1098 = vmatprep.mubr.bf16.mxu0 %v2388_v1 }
 0x116   : > { %1867 = vmatmul.mubr.msk.bf16.gmra.mrb[12].mxu0 %vm891_vm1, %v640_v3 }
 0x117   : > { %1108 = vmatprep.mubr.bf16.mxu0 %v2388_v1 }
 0x11e   : > { %1868 = vmatmul.mubr.msk.bf16.gmra.mrb[16].mxu0 %vm891_vm1, %v643_v11  ;;  %v2248_v11 = vld [vmem:[%s3061_s7 + $0x8] sm:$0xff]  }
 0x11f   : > { %1118 = vmatprep.mubr.bf16.mxu0 %v2388_v1 }
 0x126   : > { %1869 = vmatmul.mubr.msk.bf16.gmra.mrb[20].mxu0 %vm891_vm1, %v646_v33 }
 0x127   : > { %1128 = vmatprep.mubr.bf16.mxu0 %v2388_v1 }
 0x12e   : > { %1870 = vmatmul.mubr.msk.bf16.gmra.mrb[24].mxu0 %vm891_vm1, %v649_v35 }
 0x12f   : > { %1138 = vmatprep.mubr.bf16.mxu0 %v2388_v1  ;;  %v691_v1 = vld [vmem:[%s3058_s4] sm:$0x3] }
 0x130   : > { %v2915_v18 = vrot.slane %v691_v1, %v2669_v54  ;;  %v2918_v28 = vrot.slane %v691_v1, %v2621_v16 }
 0x136   : > { %1871 = vmatmul.mubr.msk.bf16.gmra.mrb[28].mxu0 %vm891_vm1, %v652_v36  ;;  %v2249_v36 = vld [vmem:[%s3061_s7 + $0x10] sm:$0xff]  }
 0x1d1   : > { %v1070_v29 = vpop.f32.mrb[0].mxu0 }
 0x1d2   : > { %v2043_v30 = vadd.f32 %v1070_v29, %v2915_v18  ;;  %v1072_v32 = vpop.f32.mrb[1].mxu0 }
 0x1d3   : > { %v2044_v37 = vadd.f32 %v1072_v32, %v2918_v28  ;;  %v1074_v38 = vpop.f32.mrb[2].mxu0 }
 0x1d4   : > { %v2045_v44 = vadd.f32 %v1074_v38, %v2915_v18  ;;  %v1076_v45 = vpop.f32.mrb[3].mxu0  ;;  %v1149_v53 = vmax.f32 %v2043_v30, 0.0 }
 0x1d5   : > { %v2046_v52 = vadd.f32 %v1076_v45, %v2918_v28  ;;  %v1150_v57 = vmax.f32 %v2044_v37, 0.0 }
 0x1d6   : > { %v1151_v55 = vmax.f32 %v2045_v44, 0.0 }
 0x1d7   : > { %v1152_v54 = vmax.f32 %v2046_v52, 0.0 }
 0x1d8   : > { %v1181_v58 = vpack.c.bf16 %v1151_v55, %v1149_v53 }
 0x1d9   : > { %v1080_v61 = vpop.f32.mrb[4].mxu0  ;;  %v1182_v16 = vpack.c.bf16 %v1152_v54, %v1150_v57 }
 0x1da   : > { %v2047_v3 = vadd.f32 %v1080_v61, %v2915_v18  ;;  %v1082_v4 = vpop.f32.mrb[5].mxu0 }
 0x1db   : > { %v2048_v12 = vadd.f32 %v1082_v4, %v2918_v28  ;;  %v1084_v23 = vpop.f32.mrb[6].mxu0  ;;  %1364 = vmatprep.mubr.bf16.mxu1 %v1182_v16 }
 0x1dc   : > { %v2049_v21 = vadd.f32 %v1084_v23, %v2915_v18  ;;  %v1086_v33 = vpop.f32.mrb[7].mxu0  ;;  %1365 = vmatmul.mubr.bf16.vlgmr.msra.gmra.mrb[0].mxu1 %v1181_v58  ;;  %v1153_v34 = vmax.f32 %v2047_v3, 0.0 }
 0x1dd   : > { %v2050_v25 = vadd.f32 %v1086_v33, %v2918_v28  ;;  %1992 = vmatpush3.bf16.msra.mxu1 %v2247_v17  ;;  %v1154_v13 = vmax.f32 %v2048_v12, 0.0 }
 0x1de   : > { %v1155_v35 = vmax.f32 %v2049_v21, 0.0  ;;  %1993 = vmatprep.subr.bf16.mxu1 %v2248_v11 }
 0x1df   : > { %v1156_v14 = vmax.f32 %v2050_v25, 0.0 }
 0x1e0   : > { %v1183_v15 = vpack.c.bf16 %v1155_v35, %v1153_v34 }
 0x1e1   : > { %v1184_v24 = vpack.c.bf16 %v1156_v14, %v1154_v13  ;;  %v1090_v19 = vpop.f32.mrb[8].mxu0  ;;  %1994 = vmatpush3.bf16.msra.mxu1 %v2248_v11 }
 0x1e2   : > { %v2051_v20 = vadd.f32 %v1090_v19, %v2915_v18  ;;  %v1092_v31 = vpop.f32.mrb[9].mxu0  ;;  %1995 = vmatprep.subr.bf16.mxu1 %v2249_v36 }
 0x1e3   : > { %v2052_v40 = vadd.f32 %v1092_v31, %v2918_v28  ;;  %v1094_v41 = vpop.f32.mrb[10].mxu0  ;;  %1372 = vmatprep.mubr.bf16.mxu1 %v1184_v24 }
 0x1e4   : > { %v2053_v26 = vadd.f32 %v1094_v41, %v2915_v18  ;;  %v1096_v42 = vpop.f32.mrb[11].mxu0  ;;  %1373 = vmatmul.mubr.bf16.gmra.mrb[4].mxu1 %v1183_v15  ;;  %v1157_v46 = vmax.f32 %v2051_v20, 0.0 }
 0x1e5   : > { %v2054_v43 = vadd.f32 %v1096_v42, %v2918_v28  ;;  %1996 = vmatpush3.bf16.msra.mxu1 %v2249_v36  ;;  %v1158_v49 = vmax.f32 %v2052_v40, 0.0 }
 0x1e6   : > { %v1159_v27 = vmax.f32 %v2053_v26, 0.0  ;;  %1997 = vmatprep.subr.bf16.mxu1 %v2250_v39 }
 0x1e7   : > { %v1160_v51 = vmax.f32 %v2054_v43, 0.0 }
 0x1e8   : > { %v1185_v56 = vpack.c.bf16 %v1159_v27, %v1157_v46 }
 0x1e9   : > { %v1186_v62 = vpack.c.bf16 %v1160_v51, %v1158_v49  ;;  %v1100_v63 = vpop.f32.mrb[12].mxu0  ;;  %1998 = vmatpush3.bf16.msra.mxu1 %v2250_v39 }
 0x1ea   : > { %v2055_v0 = vadd.f32 %v1100_v63, %v2915_v18  ;;  %v1102_v5 = vpop.f32.mrb[13].mxu0  ;;  %1999 = vmatprep.subr.bf16.mxu1 %v2251_v48 }
 0x1eb   : > { %v2056_v50 = vadd.f32 %v1102_v5, %v2918_v28  ;;  %v1104_v59 = vpop.f32.mrb[14].mxu0  ;;  %1380 = vmatprep.mubr.bf16.mxu1 %v1186_v62 }
 0x1ec   : > { %v2057_v7 = vadd.f32 %v1104_v59, %v2915_v18  ;;  %v1106_v8 = vpop.f32.mrb[15].mxu0  ;;  %1381 = vmatmul.mubr.bf16.gmra.mrb[8].mxu1 %v1185_v56  ;;  %v1161_v60 = vmax.f32 %v2055_v0, 0.0 }
 0x1ed   : > { %v2058_v22 = vadd.f32 %v1106_v8, %v2918_v28  ;;  %2000 = vmatpush3.bf16.msra.mxu1 %v2251_v48  ;;  %v1162_v6 = vmax.f32 %v2056_v50, 0.0 }
 0x1ee   : > { %v1163_v2 = vmax.f32 %v2057_v7, 0.0  ;;  %2001 = vmatprep.subr.bf16.mxu1 %v2252_v47 }
 0x1ef   : > { %v1164_v9 = vmax.f32 %v2058_v22, 0.0 }
 0x1f0   : > { %v1187_v10 = vpack.c.bf16 %v1163_v2, %v1161_v60  ;;  %v2253_v60 = vld [vmem:[%s3061_s7 + $0x30] sm:$0xff]   ;;  %v2976_v2 = vld [vmem:[%s3060_s6] ss:$0 sm:$0xff] }
 0x1f1   : > { %v1188_v17 = vpack.c.bf16 %v1164_v9, %v1162_v6  ;;  %v1110_v1 = vpop.f32.mrb[16].mxu0  ;;  %2002 = vmatpush3.bf16.msra.mxu1 %v2252_v47 }
 0x1f2   : > { %v2059_v29 = vadd.f32 %v1110_v1, %v2915_v18  ;;  %v1112_v30 = vpop.f32.mrb[17].mxu0  ;;  %2003 = vmatprep.subr.bf16.mxu1 %v2253_v60 }
 0x1f3   : > { %v2060_v32 = vadd.f32 %v1112_v30, %v2918_v28  ;;  %v1114_v37 = vpop.f32.mrb[18].mxu0  ;;  %1388 = vmatprep.mubr.bf16.mxu1 %v1188_v17 }
 0x1f4   : > { %v2061_v38 = vadd.f32 %v1114_v37, %v2915_v18  ;;  %v1116_v44 = vpop.f32.mrb[19].mxu0  ;;  %1389 = vmatmul.mubr.bf16.gmra.mrb[12].mxu1 %v1187_v10  ;;  %v1165_v52 = vmax.f32 %v2059_v29, 0.0 }
 0x1f5   : > { %v2062_v45 = vadd.f32 %v1116_v44, %v2918_v28  ;;  %v1166_v55 = vmax.f32 %v2060_v32, 0.0  ;;  %2004 = vmatpush3.bf16.msra.mxu1 %v2253_v60 }
 0x1f6   : > { %v1167_v53 = vmax.f32 %v2061_v38, 0.0 }
 0x1f7   : > { %v1168_v57 = vmax.f32 %v2062_v45, 0.0 }
 0x1f8   : > { %v1189_v54 = vpack.c.bf16 %v1167_v53, %v1165_v52 }
 0x1f9   : > { %v1190_v58 = vpack.c.bf16 %v1168_v57, %v1166_v55  ;;  %v1120_v61 = vpop.f32.mrb[20].mxu0 }
 0x1fa   : > { %v2063_v16 = vadd.f32 %v1120_v61, %v2915_v18  ;;  %v1122_v3 = vpop.f32.mrb[21].mxu0 }
 0x1fb   : > { %v2064_v4 = vadd.f32 %v1122_v3, %v2918_v28  ;;  %v1124_v11 = vpop.f32.mrb[22].mxu0  ;;  %1396 = vmatprep.mubr.bf16.mxu1 %v1190_v58 }
 0x1fc   : > { %v2065_v12 = vadd.f32 %v1124_v11, %v2915_v18  ;;  %v1126_v23 = vpop.f32.mrb[23].mxu0  ;;  %1397 = vmatmul.mubr.bf16.gmra.mrb[16].mxu1 %v1189_v54  ;;  %v1169_v33 = vmax.f32 %v2063_v16, 0.0 }
 0x1fd   : > { %v2066_v21 = vadd.f32 %v1126_v23, %v2918_v28  ;;  %v1170_v34 = vmax.f32 %v2064_v4, 0.0 }
 0x1fe   : > { %v1171_v25 = vmax.f32 %v2065_v12, 0.0 }
 0x1ff   : > { %v1172_v35 = vmax.f32 %v2066_v21, 0.0 }
 0x200   : > { %v1191_v36 = vpack.c.bf16 %v1171_v25, %v1169_v33 }
 0x201   : > { %v1192_v13 = vpack.c.bf16 %v1172_v35, %v1170_v34  ;;  %v1130_v14 = vpop.f32.mrb[24].mxu0 }
 0x202   : > { %v2067_v15 = vadd.f32 %v1130_v14, %v2915_v18  ;;  %v1132_v24 = vpop.f32.mrb[25].mxu0 }
 0x203   : > { %v2068_v19 = vadd.f32 %v1132_v24, %v2918_v28  ;;  %v1134_v20 = vpop.f32.mrb[26].mxu0  ;;  %1404 = vmatprep.mubr.bf16.mxu1 %v1192_v13 }
 0x204   : > { %v2069_v31 = vadd.f32 %v1134_v20, %v2915_v18  ;;  %v1136_v39 = vpop.f32.mrb[27].mxu0  ;;  %1405 = vmatmul.mubr.bf16.gmra.mrb[20].mxu1 %v1191_v36  ;;  %v1173_v41 = vmax.f32 %v2067_v15, 0.0 }
 0x205   : > { %v2070_v40 = vadd.f32 %v1136_v39, %v2918_v28  ;;  %v1174_v42 = vmax.f32 %v2068_v19, 0.0 }
 0x206   : > { %v1175_v26 = vmax.f32 %v2069_v31, 0.0 }
 0x207   : > { %v1176_v43 = vmax.f32 %v2070_v40, 0.0 }
 0x208   : > { %v1193_v46 = vpack.c.bf16 %v1175_v26, %v1173_v41 }
 0x209   : > { %v1194_v27 = vpack.c.bf16 %v1176_v43, %v1174_v42  ;;  %v1140_v48 = vpop.f32.mrb[28].mxu0 }
 0x20a   : > { %v2071_v49 = vadd.f32 %v1140_v48, %v2915_v18  ;;  %v1142_v51 = vpop.f32.mrb[29].mxu0 }
 0x20b   : > { %v2072_v56 = vadd.f32 %v1142_v51, %v2918_v28  ;;  %v1144_v62 = vpop.f32.mrb[30].mxu0  ;;  %1412 = vmatprep.mubr.bf16.mxu1 %v1194_v27 }
 0x20c   : > { %v2073_v63 = vadd.f32 %v1144_v62, %v2915_v18  ;;  %v1146_v0 = vpop.f32.mrb[31].mxu0  ;;  %1413 = vmatmul.mubr.bf16.gmra.mrb[24].mxu1 %v1193_v46  ;;  %v1177_v47 = vmax.f32 %v2071_v49, 0.0  ;;  %v2254_v18 = vld [vmem:[%s3061_s7 + $0x38] sm:$0xff]  }
 0x20d   : > { %v2074_v5 = vadd.f32 %v1146_v0, %v2918_v28  ;;  %v1178_v59 = vmax.f32 %v2072_v56, 0.0  ;;  %2005 = vmatprep.subr.bf16.mxu1 %v2254_v18 }
 0x20e   : > { %v1179_v50 = vmax.f32 %v2073_v63, 0.0  ;;  %2006 = vmatpush3.bf16.msra.mxu1 %v2254_v18 }
 0x20f   : > { %v1180_v7 = vmax.f32 %v2074_v5, 0.0 }
 0x210   : > { %v1195_v8 = vpack.c.bf16 %v1179_v50, %v1177_v47 }
 0x211   : > { %v1196_v22 = vpack.c.bf16 %v1180_v7, %v1178_v59 }
 0x213   : > { %1420 = vmatprep.mubr.bf16.mxu1 %v1196_v22 }
 0x214   : > { %1421 = vmatmul.mubr.bf16.gmra.mrb[28].mxu1 %v1195_v8 }
 0x2af   : > { %v1918_v28 = vpop.f32.mrb[0].mxu1 }
 0x2b0   : > { %v1919_v6 = vpop.f32.mrb[1].mxu1 }
 0x2b1   : > { %v1920_v9 = vadd.f32 %v1919_v6, %v1918_v28  ;;  %v1921_v10 = vpop.f32.mrb[2].mxu1 }
 0x2b2   : > { %v1922_v17 = vpop.f32.mrb[3].mxu1 }
 0x2b3   : > { %v1367_v1 = vadd.f32 %v1920_v9, %v2976_v2  ;;  %v1923_v29 = vadd.f32 %v1922_v17, %v1921_v10 }
 0x2b5   : > { %v1370_v30 = vadd.f32 %v1923_v29, %v2976_v2  ;;  %v1429_v32 = vmax.f32 %v1367_v1, 0.0 }
 0x2b7   : > { %v1430_v37 = vmax.f32 %v1370_v30, 0.0  ;;  %v1924_v38 = vpop.f32.mrb[4].mxu1 }
 0x2b8   : > { %v1925_v44 = vpop.f32.mrb[5].mxu1 }
 0x2b9   : > { %v1926_v45 = vadd.f32 %v1925_v44, %v1924_v38  ;;  %v1927_v52 = vpop.f32.mrb[6].mxu1  ;;  %v1445_v53 = vpack.c.bf16 %v1430_v37, %v1429_v32 }
 0x2ba   : > { %v1928_v55 = vpop.f32.mrb[7].mxu1 }
 0x2bb   : > { %v1375_v57 = vadd.f32 %v1926_v45, %v2976_v2  ;;  %v1929_v54 = vadd.f32 %v1928_v55, %v1927_v52  ;;  %2007 = vmatprep.mubr.bf16.mxu1 %v1445_v53 }
 0x2bd   : > { %v1378_v58 = vadd.f32 %v1929_v54, %v2976_v2  ;;  %v1431_v61 = vmax.f32 %v1375_v57, 0.0 }
 0x2bf   : > { %v1432_v16 = vmax.f32 %v1378_v58, 0.0  ;;  %v1930_v3 = vpop.f32.mrb[8].mxu1 }
 0x2c0   : > { %v1931_v4 = vpop.f32.mrb[9].mxu1 }
 0x2c1   : > { %v1446_v11 = vpack.c.bf16 %v1432_v16, %v1431_v61  ;;  %v1932_v12 = vadd.f32 %v1931_v4, %v1930_v3  ;;  %v1933_v23 = vpop.f32.mrb[10].mxu1 }
 0x2c2   : > { %v1934_v21 = vpop.f32.mrb[11].mxu1 }
 0x2c3   : > { %v1383_v33 = vadd.f32 %v1932_v12, %v2976_v2  ;;  %v1935_v25 = vadd.f32 %v1934_v21, %v1933_v23  ;;  %2008 = vmatmul.mubr.bf16.vlgmr.msra.gmra.mrb[32].mxu1 %v1446_v11  ;;  %v2389_v23 = vmov 0.0   ;;  %v1898_v21 = vld [vmem:[#allocation2] ss:$0 sm:$0xff] }
 0x2c4   : > { %2023 = vmatprep.subr.bf16.mxu1 %v2389_v23  ;;  %1653 = vperm.xlu0 %2173, %v1898_v21  }
 0x2c5   : > { %v1386_v34 = vadd.f32 %v1935_v25, %v2976_v2  ;;  %v1433_v35 = vmax.f32 %v1383_v33, 0.0  ;;  %v2999_v33 = vld [vmem:[%s3062_s8] ss:$0 sm:$0xff] }
 0x2c7   : > { %v1434_v36 = vmax.f32 %v1386_v34, 0.0  ;;  %v1936_v13 = vpop.f32.mrb[12].mxu1 }
 0x2c8   : > { %v1937_v14 = vpop.f32.mrb[13].mxu1 }
 0x2c9   : > { %v1938_v15 = vadd.f32 %v1937_v14, %v1936_v13  ;;  %v1939_v24 = vpop.f32.mrb[14].mxu1  ;;  %v1447_v19 = vpack.c.bf16 %v1434_v36, %v1433_v35 }
 0x2ca   : > { %v1940_v20 = vpop.f32.mrb[15].mxu1 }
 0x2cb   : > { %v1391_v31 = vadd.f32 %v1938_v15, %v2976_v2  ;;  %v1941_v39 = vadd.f32 %v1940_v20, %v1939_v24  ;;  %2011 = vmatprep.mubr.bf16.mxu1 %v1447_v19 }
 0x2cd   : > { %v1394_v40 = vadd.f32 %v1941_v39, %v2976_v2  ;;  %v1435_v41 = vmax.f32 %v1391_v31, 0.0 }
 0x2cf   : > { %v1436_v26 = vmax.f32 %v1394_v40, 0.0  ;;  %v1942_v42 = vpop.f32.mrb[16].mxu1 }
 0x2d0   : > { %v1943_v43 = vpop.f32.mrb[17].mxu1 }
 0x2d1   : > { %v1944_v46 = vadd.f32 %v1943_v43, %v1942_v42  ;;  %v1945_v27 = vpop.f32.mrb[18].mxu1  ;;  %v1448_v48 = vpack.c.bf16 %v1436_v26, %v1435_v41 }
 0x2d2   : > { %v1946_v49 = vpop.f32.mrb[19].mxu1 }
 0x2d3   : > { %v1399_v51 = vadd.f32 %v1944_v46, %v2976_v2  ;;  %v1947_v56 = vadd.f32 %v1946_v49, %v1945_v27  ;;  %2012 = vmatmul.mubr.bf16.gmra.mrb[36].mxu1 %v1448_v48 }
 0x2d5   : > { %v1402_v62 = vadd.f32 %v1947_v56, %v2976_v2  ;;  %v1437_v63 = vmax.f32 %v1399_v51, 0.0 }
 0x2d7   : > { %v1438_v0 = vmax.f32 %v1402_v62, 0.0  ;;  %v1948_v5 = vpop.f32.mrb[20].mxu1 }
 0x2d8   : > { %v1949_v47 = vpop.f32.mrb[21].mxu1 }
 0x2d9   : > { %v1950_v50 = vadd.f32 %v1949_v47, %v1948_v5  ;;  %v1951_v59 = vpop.f32.mrb[22].mxu1  ;;  %v1449_v7 = vpack.c.bf16 %v1438_v0, %v1437_v63 }
 0x2da   : > { %v1952_v8 = vpop.f32.mrb[23].mxu1 }
 0x2db   : > { %v1407_v22 = vadd.f32 %v1950_v50, %v2976_v2  ;;  %v1953_v60 = vadd.f32 %v1952_v8, %v1951_v59  ;;  %2015 = vmatprep.mubr.bf16.mxu1 %v1449_v7 }
 0x2dd   : > { %v1410_v18 = vadd.f32 %v1953_v60, %v2976_v2  ;;  %v1439_v28 = vmax.f32 %v1407_v22, 0.0 }
 0x2df   : > { %v1440_v6 = vmax.f32 %v1410_v18, 0.0  ;;  %v1954_v9 = vpop.f32.mrb[24].mxu1 }
 0x2e0   : > { %v1955_v10 = vpop.f32.mrb[25].mxu1 }
 0x2e1   : > { %v1956_v17 = vadd.f32 %v1955_v10, %v1954_v9  ;;  %v1957_v1 = vpop.f32.mrb[26].mxu1  ;;  %v1450_v29 = vpack.c.bf16 %v1440_v6, %v1439_v28 }
 0x2e2   : > { %v1958_v30 = vpop.f32.mrb[27].mxu1 }
 0x2e3   : > { %v1415_v32 = vadd.f32 %v1956_v17, %v2976_v2  ;;  %v1959_v37 = vadd.f32 %v1958_v30, %v1957_v1  ;;  %2016 = vmatmul.mubr.bf16.gmra.mrb[40].mxu1 %v1450_v29 }
 0x2e5   : > { %v1418_v38 = vadd.f32 %v1959_v37, %v2976_v2  ;;  %v1441_v44 = vmax.f32 %v1415_v32, 0.0 }
 0x2e7   : > { %v1442_v45 = vmax.f32 %v1418_v38, 0.0  ;;  %v1960_v52 = vpop.f32.mrb[28].mxu1 }
 0x2e8   : > { %v1961_v53 = vpop.f32.mrb[29].mxu1 }
 0x2e9   : > { %v1962_v55 = vadd.f32 %v1961_v53, %v1960_v52  ;;  %v1963_v57 = vpop.f32.mrb[30].mxu1  ;;  %v1451_v54 = vpack.c.bf16 %v1442_v45, %v1441_v44 }
 0x2ea   : > { %v1964_v58 = vpop.f32.mrb[31].mxu1 }
 0x2eb   : > { %v1423_v61 = vadd.f32 %v1962_v55, %v2976_v2  ;;  %v1965_v16 = vadd.f32 %v1964_v58, %v1963_v57  ;;  %2019 = vmatprep.mubr.bf16.mxu1 %v1451_v54 }
 0x2ed   : > { %v1426_v3 = vadd.f32 %v1965_v16, %v2976_v2  ;;  %v1443_v4 = vmax.f32 %v1423_v61, 0.0 }
 0x2ef   : > { %v1444_v11 = vmax.f32 %v1426_v3, 0.0 }
 0x2f1   : > { %v1452_v12 = vpack.c.bf16 %v1444_v11, %v1443_v4 }
 0x2f3   : > { %2020 = vmatmul.mubr.bf16.gmra.mrb[44].mxu1 %v1452_v12 }
 0x2f4   : > { %2039 = vmatprep.mubr.msk.bf16.mxu1 %vm2390_vm2, %v2389_v23 }
 0x396   : > { %v2009_v25 = vpop.f32.mrb[32].mxu1 }
 0x397   : > { %v1567_v2 = vadd.f32 %v2009_v25, %v2999_v33  ;;  %v1558_v34 = vpop.f32.mrb[33].mxu1 }
 0x398   : > { %v1559_v35 = vadd.f32 %v2999_v33, %v1558_v34  ;;  %v2010_v36 = vpop.f32.mrb[34].mxu1  ;;  %v1654_v34 = vpop.permute.xlu0 %1653 }
 0x399   : > { %v1570_v13 = vadd.f32 %v2010_v36, %v2999_v33  ;;  %v1561_v14 = vpop.f32.mrb[35].mxu1  ;;  %v1623_v24 = vmax.f32 %v1567_v2, 0.0 }
 0x39a   : > { %v1562_v15 = vadd.f32 %v2999_v33, %v1561_v14  ;;  %v1621_v20 = vmax.f32 %v1559_v35, 0.0 }
 0x39b   : > { %v1624_v19 = vmax.f32 %v1570_v13, 0.0 }
 0x39c   : > { %v1622_v31 = vmax.f32 %v1562_v15, 0.0 }
 0x39d   : > { %v1638_v39 = vpack.c.bf16 %v1624_v19, %v1623_v24 }
 0x39e   : > { %v1637_v40 = vpack.c.bf16 %v1622_v31, %v1621_v20 }
 0x39f   : > { %v1664_v48 = vsel %vm1656_vm3, %v1638_v39, 0 }
 0x3a0   : > { %v1661_v41 = vsel %vm1656_vm3, %v1637_v40, 0 }
 0x3a1   : > { %2024 = vmatpush3.bf16.xpose.msra.mxu1 %v1661_v41 }
 0x3a2   : > { %2025 = vmatprep.subr.bf16.mxu1 %v2389_v23 }
 0x3a6   : > { %v2013_v26 = vpop.f32.mrb[36].mxu1 }
 0x3a7   : > { %v1583_v42 = vadd.f32 %v2013_v26, %v2999_v33  ;;  %v1574_v43 = vpop.f32.mrb[37].mxu1 }
 0x3a8   : > { %v1575_v46 = vadd.f32 %v2999_v33, %v1574_v43  ;;  %v2014_v27 = vpop.f32.mrb[38].mxu1 }
 0x3a9   : > { %v1586_v49 = vadd.f32 %v2014_v27, %v2999_v33  ;;  %v1577_v51 = vpop.f32.mrb[39].mxu1  ;;  %2026 = vmatpush3.bf16.xpose.msra.mxu1 %v1664_v48  ;;  %v1627_v62 = vmax.f32 %v1583_v42, 0.0 }
 0x3aa   : > { %v1578_v56 = vadd.f32 %v2999_v33, %v1577_v51  ;;  %2027 = vmatprep.subr.bf16.mxu1 %v2389_v23  ;;  %v1625_v0 = vmax.f32 %v1575_v46, 0.0 }
 0x3ab   : > { %v1628_v63 = vmax.f32 %v1586_v49, 0.0 }
 0x3ac   : > { %v1626_v5 = vmax.f32 %v1578_v56, 0.0 }
 0x3ad   : > { %v1640_v47 = vpack.c.bf16 %v1628_v63, %v1627_v62 }
 0x3ae   : > { %v1639_v50 = vpack.c.bf16 %v1626_v5, %v1625_v0 }
 0x3af   : > { %v1670_v28 = vsel %vm1656_vm3, %v1640_v47, 0 }
 0x3b0   : > { %v1667_v59 = vsel %vm1656_vm3, %v1639_v50, 0 }
 0x3b1   : > { %2028 = vmatpush3.bf16.xpose.msra.mxu1 %v1667_v59 }
 0x3b2   : > { %2029 = vmatprep.subr.bf16.mxu1 %v2389_v23 }
 0x3b6   : > { %v2017_v7 = vpop.f32.mrb[40].mxu1 }
 0x3b7   : > { %v1599_v8 = vadd.f32 %v2017_v7, %v2999_v33  ;;  %v1590_v22 = vpop.f32.mrb[41].mxu1 }
 0x3b8   : > { %v1591_v60 = vadd.f32 %v2999_v33, %v1590_v22  ;;  %v2018_v18 = vpop.f32.mrb[42].mxu1 }
 0x3b9   : > { %v1602_v6 = vadd.f32 %v2018_v18, %v2999_v33  ;;  %v1593_v9 = vpop.f32.mrb[43].mxu1  ;;  %2030 = vmatpush3.bf16.xpose.msra.mxu1 %v1670_v28  ;;  %v1631_v17 = vmax.f32 %v1599_v8, 0.0 }
 0x3ba   : > { %v1594_v10 = vadd.f32 %v2999_v33, %v1593_v9  ;;  %2031 = vmatprep.subr.bf16.mxu1 %v2389_v23  ;;  %v1629_v29 = vmax.f32 %v1591_v60, 0.0 }
 0x3bb   : > { %v1632_v1 = vmax.f32 %v1602_v6, 0.0 }
 0x3bc   : > { %v1630_v30 = vmax.f32 %v1594_v10, 0.0 }
 0x3bd   : > { %v1642_v32 = vpack.c.bf16 %v1632_v1, %v1631_v17 }
 0x3be   : > { %v1641_v37 = vpack.c.bf16 %v1630_v30, %v1629_v29 }
 0x3bf   : > { %v1676_v57 = vsel %vm1656_vm3, %v1642_v32, 0 }
 0x3c0   : > { %v1673_v38 = vsel %vm1656_vm3, %v1641_v37, 0 }
 0x3c1   : > { %2032 = vmatpush3.bf16.xpose.msra.mxu1 %v1673_v38 }
 0x3c2   : > { %2033 = vmatprep.subr.bf16.mxu1 %v2389_v23 }
 0x3c6   : > { %v2021_v44 = vpop.f32.mrb[44].mxu1 }
 0x3c7   : > { %v1615_v45 = vadd.f32 %v2021_v44, %v2999_v33  ;;  %v1606_v52 = vpop.f32.mrb[45].mxu1 }
 0x3c8   : > { %v1607_v53 = vadd.f32 %v2999_v33, %v1606_v52  ;;  %v2022_v55 = vpop.f32.mrb[46].mxu1 }
 0x3c9   : > { %v1618_v54 = vadd.f32 %v2022_v55, %v2999_v33  ;;  %v1609_v58 = vpop.f32.mrb[47].mxu1  ;;  %2034 = vmatpush3.bf16.xpose.msra.mxu1 %v1676_v57  ;;  %v1635_v16 = vmax.f32 %v1615_v45, 0.0 }
 0x3ca   : > { %v1610_v61 = vadd.f32 %v2999_v33, %v1609_v58  ;;  %2035 = vmatprep.subr.bf16.mxu1 %v2389_v23  ;;  %v1633_v4 = vmax.f32 %v1607_v53, 0.0  ;;  %v1645_v33 = vld [vmem:[%s3063_s9] sm:$0xf] }
 0x3cb   : > { %v1636_v3 = vmax.f32 %v1618_v54, 0.0 }
 0x3cc   : > { %v1634_v11 = vmax.f32 %v1610_v61, 0.0 }
 0x3cd   : > { %v1644_v12 = vpack.c.bf16 %v1636_v3, %v1635_v16 }
 0x3ce   : > { %v1643_v21 = vpack.c.bf16 %v1634_v11, %v1633_v4 }
 0x3cf   : > { %v1682_v2 = vsel %vm1656_vm3, %v1644_v12, 0 }
 0x3d0   : > { %v1679_v25 = vsel %vm1656_vm3, %v1643_v21, 0 }
 0x3d1   : > { %2036 = vmatpush3.bf16.xpose.msra.mxu1 %v1679_v25 }
 0x3d2   : > { %2037 = vmatprep.subr.bf16.mxu1 %v2389_v23 }
 0x3d9   : > { %2038 = vmatpush3.bf16.xpose.msra.mxu1 %v1682_v2 }
 0x3e0   : > { %2040 = vmatmul.mubr.msk.bf16.vlgmr.msra.gmra.mrb[48].mxu1 %vm1656_vm3, %v1645_v33 }
 0x4b3   : > { %v1718_v35 = vpop.f32.mrb[48].mxu1 }
 0x4b4   : > { %v1719_v36 = vadd.f32 %v1718_v35, %v1654_v34  ;;  %v2041_v23 = vpop.f32.mrb[49].mxu1 }
 0x4b5   : > { %v1721_v13 = vpop.f32.mrb[50].mxu1 }
 0x4b6   : > { %1724 = vst [vmem:[%s449_s26] sm:$0xff] %v1719_v36  ;;  %v2042_v14 = vpop.f32.mrb[51].mxu1 }
 0x4b7 PF: > { %s3084_s22 = sld [smem:[#allocation10_spill]]  ;;  %s3085_s16 = sld [smem:[#allocation11_spill]] }
 0x4b8   : > { %s3086_s19 = smov %s2369_s20  ;;  %s3087_s20 = smov %s2373_s21 }
 0x4bd   : > { %p24_p6 = scmp.ge.s32.totalorder %s3084_s22, 4   ;;  %s3088_s21 = smov %s3085_s16 }
 0x4bf   :  { %26 = sbr.rel (!%p24_p6) target bundleno = 7 (0x7), region = 112 }
 0x4c6   :  { %1744 = vsyncpa [#allocation4], 1 }
 0x4c7   :  { %1746 = vsyncpa [#allocation4 + $0x1], 1 }
 0x4c8   :  { %1747 = vsyncpa [#allocation6], 1 }

</bundles_post_ra>
